<compile_context>
chip_gen: v6e
topology: v6e:2x2x1
jax: 0.10.0
libtpu: 0.0.40
codegen_flags: <defaults>
</compile_context>

<pallas_src>
import math
import numpy as np
import jax
import jax.numpy as jnp
from jax import lax
from jax.experimental import pallas as pl
from jax.experimental.pallas import tpu as pltpu

# ---- static problem sizes (small, consistent with the module) ----
N_NODES = 8
N_EDGES = 16
C_IN = 16          # irreps_input  = 16x0e
C_OUT = 16         # irreps_output = 16x0e
A_DIM = 8          # irreps_node_attr = 8x0e
Q_DIM = 16         # irreps_query = 16x0e
K_DIM = 16         # irreps_key   = 16x0e
EDGE_ATTR_DIM = 8
N_BASIS = 8
HIDDEN = 128       # FullyConnectedNet hidden width (fixed in __init__)
MAX_RADIUS = 6.0
SILU_NORM = 1.679  # e3nn normalize2mom constant for silu (approximate)
# smooth_finite basis constant * sqrt(number_of_basis), folded into fc layer-1 weights at init
BASIS_CONST = 1.14136 * (math.e ** 2) * (N_BASIS ** 0.5)

# ---- constant expand / reduce matrices: built and uploaded ONCE at module scope ----
# x expansion:   x_tiled[e, m*C_IN + i] = x_src[e, i]  for m in [0, K_DIM + C_OUT)
_T_X = jnp.asarray(np.tile(np.eye(C_IN, dtype=np.float32), (1, K_DIM + C_OUT)))           # (16, 512)
# attr expansion: attr_t[n, o*A_DIM + a] = attr[n, a]
_T_ATTR = jnp.asarray(np.tile(np.eye(A_DIM, dtype=np.float32), (1, C_OUT)))               # (8, 128)
# merged k|v reduce (block-diagonal), 1/sqrt(C_IN) tensor-product norm folded in
_R_KV = jnp.asarray(np.repeat(np.eye(K_DIM + C_OUT, dtype=np.float32), C_IN, axis=0)
                    * np.float32(1.0 / math.sqrt(C_IN)))                                   # (512, 32)
# self-interaction reduce, 1/sqrt(C_IN*A_DIM) norm folded in
_R_SI = jnp.asarray(np.repeat(np.eye(C_OUT, dtype=np.float32), A_DIM, axis=0)
                    * np.float32(1.0 / math.sqrt(C_IN * A_DIM)))                           # (128, 16)


def _soft_unit_step(t):
    # e3nn soft_unit_step: exp(-1/t) for t > 0, else 0   (1/t on the EUP approx path)
    safe = jnp.where(t > 0.0, t, 1.0)
    return jnp.where(t > 0.0, jnp.exp(-pl.reciprocal(safe, approx=True)), 0.0)


def transformer_layer_kernel(
    x_ref, pos_ref, attr_ref, edge_attr_ref,
    sd_col_ref, dst_row_ref,
    wq_ref, wsi_ref, w1e_ref, w1a_ref, w2_ref,
    tx_ref, tattr_ref, rkv_ref, rsi_ref,
    out_ref,
):
    f32 = jnp.float32
    bf16 = jnp.bfloat16
    x = x_ref[...]
    pos = pos_ref[...]
    attr = attr_ref[...]
    edge_attr = edge_attr_ref[...]
    sd_col = sd_col_ref[...]                                                        # (2E, 1): [src; dst]
    dst_row = dst_row_ref[...]                                                      # (1, E)

    # one-hot gather / scatter / same-destination matrices (pure VPU compares).
    # src and dst one-hots are stacked so a SINGLE matmul gathers both x_src and x_dst.
    node_iota_e = lax.broadcasted_iota(jnp.int32, (2 * N_EDGES, N_NODES), 1)
    onehot_both = (node_iota_e == sd_col).astype(f32)                               # (2E, N)
    onehot_src = onehot_both[:N_EDGES]                                              # (E, N)
    onehot_dst = onehot_both[N_EDGES:]                                              # (E, N)
    dst_col = sd_col[N_EDGES:]                                                      # (E, 1)
    node_iota_n = lax.broadcasted_iota(jnp.int32, (N_NODES, N_EDGES), 0)
    scat_dst = (node_iota_n == dst_row).astype(f32)                                 # (N, E)
    same_dst = (dst_col == dst_row).astype(f32)                                     # (E, E)

    # fused src/dst position gather: edge_vec in a single MXU op
    edge_vec = jnp.dot(onehot_src - onehot_dst, pos, preferred_element_type=f32)    # (E, 3)
    edge_len = jnp.sqrt(jnp.sum(edge_vec * edge_vec, axis=1, keepdims=True))        # (E, 1)

    # soft_one_hot_linspace(basis='smooth_finite', cutoff=True); the 1.14136*e^2 basis constant
    # and the * sqrt(number_of_basis) are folded into the fc layer-1 weights (w1_emb) at init.
    step = MAX_RADIUS / (N_BASIS + 1)
    centers = (lax.broadcasted_iota(jnp.int32, (1, N_BASIS), 1).astype(f32) + 1.0) * step
    diff = (edge_len - centers) / step                                               # (E, N_BASIS)
    emb = _soft_unit_step(diff + 1.0) * _soft_unit_step(1.0 - diff)                  # (E, N_BASIS)

    edge_weight_cutoff = _soft_unit_step(10.0 * (1.0 - edge_len / MAX_RADIUS))       # (E, 1)

    # spherical harmonics: for all-0e irreps only Y_0 couples; 'component' norm => Y_0 == 1.
    # TODO(synk): l=1,2 spherical-harmonic channels are dead paths for the chosen 0e-only irreps.

    # merged fc_k | fc_v MLP.  1/sqrt(fan_in), 1/sqrt(HIDDEN), normalize2mom(silu) and the basis
    # constant are folded into the (bf16) weights at init; silu itself stays f32 (no bf16 VPU/EUP
    # on v5e).
    pre = (jnp.dot(emb.astype(bf16), w1e_ref[...], preferred_element_type=f32)
           + jnp.dot(edge_attr.astype(bf16), w1a_ref[...], preferred_element_type=f32))     # (E, 2H)
    h = jax.nn.silu(pre)
    wkv = jnp.dot(h.astype(bf16), w2_ref[...], preferred_element_type=f32)           # (E, (K+C_OUT)*C_IN)

    # one matmul gathers x over BOTH src and dst endpoints
    x_both = jnp.dot(onehot_both, x, preferred_element_type=f32)                     # (2E, C_IN)
    x_src = x_both[:N_EDGES]                                                         # (E, C_IN)
    x_dst = x_both[N_EDGES:]                                                         # (E, C_IN)

    # tp_k / tp_v merged: (k|v)[e, m] = sum_i x_src[e, i] * wkv[e, m*C_IN + i] / sqrt(C_IN)
    x_tiled = jnp.dot(x_src, tx_ref[...], preferred_element_type=f32)                # (E, 512)
    kv = jnp.dot(x_tiled * wkv, rkv_ref[...], preferred_element_type=f32)            # (E, K+C_OUT)
    k = kv[:, :K_DIM]
    v = kv[:, K_DIM:]

    # attention logits: the `dot` tensor-product weight and all norms are folded into wq_eff,
    # so temp is just the per-edge inner product <q[dst], k>.  Projecting the gathered rows is
    # bit-identical to gathering the projection (one-hot selection commutes with linear maps).
    q_dst = jnp.dot(x_dst, wq_ref[...], preferred_element_type=f32)                  # (E, K)
    temp = jnp.sum(q_dst * k, axis=1, keepdims=True)                                 # (E, 1)

    # edge softmax (cutoff inside the exponent, exactly as the reference).
    # per-edge denominator via same_dst @ exp:  z_dst >= exp > 0, so no zero-guard is needed.
    expv = jnp.exp(edge_weight_cutoff * temp)                                        # (E, 1)
    z_dst = jnp.dot(same_dst, expv, preferred_element_type=f32)                      # (E, 1)
    alpha = expv * pl.reciprocal(z_dst, approx=True)
    a = jnp.sqrt(jnp.maximum(alpha, 0.0) + 1e-14)                                    # (E, 1)

    # self interaction: FullyConnectedTensorProduct(x, node_attr); weight layout [i, o*A_DIM + a]
    wx = jnp.dot(x, wsi_ref[...], preferred_element_type=f32)                        # (N, C_OUT*A_DIM)
    attr_t = jnp.dot(attr, tattr_ref[...], preferred_element_type=f32)               # (N, C_OUT*A_DIM)
    si = jnp.dot(attr_t * wx, rsi_ref[...], preferred_element_type=f32)              # (N, C_OUT)

    # attention-weighted message aggregation (scatter over destination nodes via MXU matmul)
    agg = jnp.dot(scat_dst, a * v, preferred_element_type=f32)                       # (N, C_OUT)
    out_ref[...] = si + agg


@jax.jit
def transformer_layer_with_bond(x, pos, node_attr, edge_index, edge_attr, batch, params):
    del batch  # unused in the reference forward pass
    edge_src = edge_index[0].astype(jnp.int32)
    edge_dst = edge_index[1].astype(jnp.int32)
    sd_col = jnp.concatenate([edge_src, edge_dst]).reshape(2 * N_EDGES, 1)   # stacked [src; dst]
    dst_row = edge_dst.reshape(1, N_EDGES)

    inputs = (
        x, pos, node_attr, edge_attr,
        sd_col, dst_row,
        params["wq_eff"], params["wsi2"],
        params["w1_emb"], params["w1_ea"], params["w2_kv"],
        _T_X, _T_ATTR, _R_KV, _R_SI,
    )
    vmem = pl.BlockSpec(memory_space=pltpu.MemorySpace.VMEM)
    # TODO(synk): if N_EDGES / N_NODES grow beyond toy size, add an edge-block grid with
    # dimension_semantics=("parallel",) so v7x's two TensorCores split the edge loop.
    return pl.pallas_call(
        transformer_layer_kernel,
        out_shape=jax.ShapeDtypeStruct((N_NODES, C_OUT), jnp.float32),
        in_specs=[vmem] * len(inputs),
        out_specs=vmem,
    )(*inputs)


def init_params(key):
    """Generate synthetic raw weights, then fold all static scalars / matrices once."""
    ks = jax.random.split(key, 7)
    wq = jax.random.normal(ks[0], (C_IN, Q_DIM), jnp.float32)
    wdot = jax.random.normal(ks[1], (Q_DIM, K_DIM), jnp.float32)
    wsi2 = jax.random.normal(ks[2], (C_IN, C_OUT * A_DIM), jnp.float32)  # layout [i, o*A_DIM + a]
    w1k = jax.random.normal(ks[3], (N_BASIS + EDGE_ATTR_DIM, HIDDEN), jnp.float32)
    w2k = jax.random.normal(ks[4], (HIDDEN, K_DIM * C_IN), jnp.float32)
    w1v = jax.random.normal(ks[5], (N_BASIS + EDGE_ATTR_DIM, HIDDEN), jnp.float32)
    w2v = jax.random.normal(ks[6], (HIDDEN, C_OUT * C_IN), jnp.float32)

    inv_sqrt_in = 1.0 / math.sqrt(N_BASIS + EDGE_ATTR_DIM)
    inv_sqrt_h = 1.0 / math.sqrt(HIDDEN)

    # fold o3.Linear 1/sqrt(C_IN), the `dot` tensor-product weight and its 1/sqrt(Q*K) norm
    # into a single effective query projection
    wq_eff = (wq * (1.0 / math.sqrt(C_IN))) @ wdot * (1.0 / math.sqrt(Q_DIM * K_DIM))

    # merged fc_k | fc_v, layer 1: concat along the hidden axis, 1/sqrt(fan_in) folded in.
    # The smooth_finite basis constant and sqrt(number_of_basis) are folded into the embedding
    # rows only (they scale edge_length_embedded, not edge_attr).
    w1_kv = jnp.concatenate([w1k, w1v], axis=1) * inv_sqrt_in                        # (16, 2H)
    w1_emb = (w1_kv[:N_BASIS] * BASIS_CONST).astype(jnp.bfloat16)                    # (8, 2H)
    w1_ea = w1_kv[N_BASIS:].astype(jnp.bfloat16)                                     # (8, 2H)

    # merged layer 2: block-diagonal, with normalize2mom(silu) and 1/sqrt(HIDDEN) folded in
    z = jnp.zeros((HIDDEN, K_DIM * C_IN), jnp.float32)
    w2_kv = jnp.concatenate(
        [jnp.concatenate([w2k, z], axis=1),
         jnp.concatenate([z, w2v], axis=1)], axis=0) * (SILU_NORM * inv_sqrt_h)      # (2H, 512)
    w2_kv = w2_kv.astype(jnp.bfloat16)

    return {
        "wq_eff": wq_eff,
        "wsi2": wsi2,
        "w1_emb": w1_emb,
        "w1_ea": w1_ea,
        "w2_kv": w2_kv,
    }


if __name__ == "__main__":
    key = jax.random.PRNGKey(0)
    k_par, k_x, k_pos, k_attr, k_eattr, k_ei = jax.random.split(key, 6)

    params = init_params(k_par)
    x = jax.random.normal(k_x, (N_NODES, C_IN), jnp.float32)
    pos = jax.random.normal(k_pos, (N_NODES, 3), jnp.float32) * 1.5
    node_attr = jax.random.normal(k_attr, (N_NODES, A_DIM), jnp.float32)
    edge_attr = jax.random.normal(k_eattr, (N_EDGES, EDGE_ATTR_DIM), jnp.float32)
    edge_index = jax.random.randint(k_ei, (2, N_EDGES), 0, N_NODES, jnp.int32)
    batch = jnp.zeros((N_NODES,), jnp.int32)  # unused, mirrors the PyTorch signature

    out = transformer_layer_with_bond(x, pos, node_attr, edge_index, edge_attr, batch, params)
    out = jax.block_until_ready(out)
    assert out.shape == (N_NODES, C_OUT) and bool(jnp.all(jnp.isfinite(out)))
    print("KERNEL_OK")
</pallas_src>

<mosaic_0001>
module attributes {stable_mosaic.version = 11 : i64} {
  func.func @transformer_layer_kernel(%arg0: memref<8x16xf32, #tpu.memory_space<vmem>>, %arg1: memref<8x3xf32, #tpu.memory_space<vmem>>, %arg2: memref<8x8xf32, #tpu.memory_space<vmem>>, %arg3: memref<16x8xf32, #tpu.memory_space<vmem>>, %arg4: memref<32x1xi32, #tpu.memory_space<vmem>>, %arg5: memref<1x16xi32, #tpu.memory_space<vmem>>, %arg6: memref<16x16xf32, #tpu.memory_space<vmem>>, %arg7: memref<16x128xf32, #tpu.memory_space<vmem>>, %arg8: memref<8x256xbf16, #tpu.memory_space<vmem>>, %arg9: memref<8x256xbf16, #tpu.memory_space<vmem>>, %arg10: memref<256x512xbf16, #tpu.memory_space<vmem>>, %arg11: memref<16x512xf32, #tpu.memory_space<vmem>>, %arg12: memref<8x128xf32, #tpu.memory_space<vmem>>, %arg13: memref<512x32xf32, #tpu.memory_space<vmem>>, %arg14: memref<128x16xf32, #tpu.memory_space<vmem>>, %arg15: memref<8x16xf32, #tpu.memory_space<vmem>>) attributes {dimension_semantics = [], scalar_prefetch = 0 : i64, scratch_operands = 0 : i64, tpu.core_type = #tpu.core_type<tc>} {
    %c0 = arith.constant 0 : index
    %c0_0 = arith.constant 0 : index
    %0 = vector.load %arg0[%c0, %c0_0] : memref<8x16xf32, #tpu.memory_space<vmem>>, vector<8x16xf32>
    %c0_1 = arith.constant 0 : index
    %c0_2 = arith.constant 0 : index
    %1 = vector.load %arg1[%c0_1, %c0_2] : memref<8x3xf32, #tpu.memory_space<vmem>>, vector<8x3xf32>
    %c0_3 = arith.constant 0 : index
    %c0_4 = arith.constant 0 : index
    %2 = vector.load %arg2[%c0_3, %c0_4] : memref<8x8xf32, #tpu.memory_space<vmem>>, vector<8x8xf32>
    %c0_5 = arith.constant 0 : index
    %c0_6 = arith.constant 0 : index
    %3 = vector.load %arg3[%c0_5, %c0_6] : memref<16x8xf32, #tpu.memory_space<vmem>>, vector<16x8xf32>
    %c0_7 = arith.constant 0 : index
    %c0_8 = arith.constant 0 : index
    %4 = vector.load %arg4[%c0_7, %c0_8] : memref<32x1xi32, #tpu.memory_space<vmem>>, vector<32x1xi32>
    %c0_9 = arith.constant 0 : index
    %c0_10 = arith.constant 0 : index
    %5 = vector.load %arg5[%c0_9, %c0_10] : memref<1x16xi32, #tpu.memory_space<vmem>>, vector<1x16xi32>
    %6 = tpu.iota {dimensions = array<i32: 1>} : vector<32x8xi32>
    %7 = vector.broadcast %4 : vector<32x1xi32> to vector<32x8xi32>
    %8 = arith.cmpi eq, %6, %7 : vector<32x8xi32>
    %9 = arith.extui %8 : vector<32x8xi1> to vector<32x8xi32>
    %10 = arith.sitofp %9 : vector<32x8xi32> to vector<32x8xf32>
    %11 = vector.extract_strided_slice %10 {offsets = [0, 0], sizes = [16, 8], strides = [1, 1]} : vector<32x8xf32> to vector<16x8xf32>
    %12 = vector.extract_strided_slice %10 {offsets = [16, 0], sizes = [16, 8], strides = [1, 1]} : vector<32x8xf32> to vector<16x8xf32>
    %13 = vector.extract_strided_slice %4 {offsets = [16, 0], sizes = [16, 1], strides = [1, 1]} : vector<32x1xi32> to vector<16x1xi32>
    %14 = tpu.iota {dimensions = array<i32: 0>} : vector<8x16xi32>
    %15 = vector.broadcast %5 : vector<1x16xi32> to vector<8x16xi32>
    %16 = arith.cmpi eq, %14, %15 : vector<8x16xi32>
    %17 = arith.extui %16 : vector<8x16xi1> to vector<8x16xi32>
    %18 = arith.sitofp %17 : vector<8x16xi32> to vector<8x16xf32>
    %19 = vector.broadcast %13 : vector<16x1xi32> to vector<16x16xi32>
    %20 = vector.broadcast %5 : vector<1x16xi32> to vector<16x16xi32>
    %21 = arith.cmpi eq, %19, %20 : vector<16x16xi32>
    %22 = arith.extui %21 : vector<16x16xi1> to vector<16x16xi32>
    %23 = arith.sitofp %22 : vector<16x16xi32> to vector<16x16xf32>
    %24 = arith.subf %11, %12 : vector<16x8xf32>
    %cst = arith.constant dense<0.000000e+00> : vector<16x3xf32>
    %25 = tpu.matmul %24, %1, %cst {dimension_numbers = #tpu.dot_dimension_numbers<[1], [0], [0], [1], [0, 0, 1, 1], [], []>} : vector<16x8xf32>, vector<8x3xf32>, vector<16x3xf32> -> vector<16x3xf32>
    %26 = arith.mulf %25, %25 : vector<16x3xf32>
    %cst_11 = arith.constant dense<0.000000e+00> : vector<16xf32>
    %27 = vector.multi_reduction <add>, %26, %cst_11 [1] : vector<16x3xf32> to vector<16xf32>
    %28 = vector.shape_cast %27 : vector<16xf32> to vector<16x1xf32>
    %29 = math.sqrt %28 : vector<16x1xf32>
    %30 = tpu.iota {dimensions = array<i32: 1>} : vector<1x8xi32>
    %31 = arith.sitofp %30 : vector<1x8xi32> to vector<1x8xf32>
    %cst_12 = arith.constant 1.000000e+00 : f32
    %32 = vector.broadcast %cst_12 : f32 to vector<1x8xf32>
    %33 = arith.addf %31, %32 : vector<1x8xf32>
    %cst_13 = arith.constant 0.666666686 : f32
    %34 = vector.broadcast %cst_13 : f32 to vector<1x8xf32>
    %35 = arith.mulf %33, %34 : vector<1x8xf32>
    %36 = vector.broadcast %29 : vector<16x1xf32> to vector<16x8xf32>
    %37 = vector.broadcast %35 : vector<1x8xf32> to vector<16x8xf32>
    %38 = arith.subf %36, %37 : vector<16x8xf32>
    %cst_14 = arith.constant 0.666666686 : f32
    %39 = vector.broadcast %cst_14 : f32 to vector<16x8xf32>
    %40 = arith.divf %38, %39 : vector<16x8xf32>
    %cst_15 = arith.constant 1.000000e+00 : f32
    %41 = vector.broadcast %cst_15 : f32 to vector<16x8xf32>
    %42 = arith.addf %40, %41 : vector<16x8xf32>
    %cst_16 = arith.constant 0.000000e+00 : f32
    %43 = vector.broadcast %cst_16 : f32 to vector<16x8xf32>
    %44 = arith.cmpf ogt, %42, %43 : vector<16x8xf32>
    %cst_17 = arith.constant 1.000000e+00 : f32
    %45 = vector.broadcast %cst_17 : f32 to vector<16x8xf32>
    %46 = arith.select %44, %42, %45 : vector<16x8xi1>, vector<16x8xf32>
    %cst_18 = arith.constant 0.000000e+00 : f32
    %47 = vector.broadcast %cst_18 : f32 to vector<16x8xf32>
    %48 = arith.cmpf ogt, %42, %47 : vector<16x8xf32>
    %49 = tpu.reciprocal %46 {approx = true} : vector<16x8xf32> -> vector<16x8xf32>
    %cst_19 = arith.constant 0.000000e+00 : f32
    %50 = vector.broadcast %cst_19 : f32 to vector<16x8xf32>
    %51 = arith.subf %50, %49 : vector<16x8xf32>
    %52 = math.exp %51 : vector<16x8xf32>
    %cst_20 = arith.constant 0.000000e+00 : f32
    %53 = vector.broadcast %cst_20 : f32 to vector<16x8xf32>
    %54 = arith.select %48, %52, %53 : vector<16x8xi1>, vector<16x8xf32>
    %cst_21 = arith.constant 1.000000e+00 : f32
    %55 = vector.broadcast %cst_21 : f32 to vector<16x8xf32>
    %56 = arith.subf %55, %40 : vector<16x8xf32>
    %cst_22 = arith.constant 0.000000e+00 : f32
    %57 = vector.broadcast %cst_22 : f32 to vector<16x8xf32>
    %58 = arith.cmpf ogt, %56, %57 : vector<16x8xf32>
    %cst_23 = arith.constant 1.000000e+00 : f32
    %59 = vector.broadcast %cst_23 : f32 to vector<16x8xf32>
    %60 = arith.select %58, %56, %59 : vector<16x8xi1>, vector<16x8xf32>
    %cst_24 = arith.constant 0.000000e+00 : f32
    %61 = vector.broadcast %cst_24 : f32 to vector<16x8xf32>
    %62 = arith.cmpf ogt, %56, %61 : vector<16x8xf32>
    %63 = tpu.reciprocal %60 {approx = true} : vector<16x8xf32> -> vector<16x8xf32>
    %cst_25 = arith.constant 0.000000e+00 : f32
    %64 = vector.broadcast %cst_25 : f32 to vector<16x8xf32>
    %65 = arith.subf %64, %63 : vector<16x8xf32>
    %66 = math.exp %65 : vector<16x8xf32>
    %cst_26 = arith.constant 0.000000e+00 : f32
    %67 = vector.broadcast %cst_26 : f32 to vector<16x8xf32>
    %68 = arith.select %62, %66, %67 : vector<16x8xi1>, vector<16x8xf32>
    %69 = arith.mulf %54, %68 : vector<16x8xf32>
    %cst_27 = arith.constant 6.000000e+00 : f32
    %70 = vector.broadcast %cst_27 : f32 to vector<16x1xf32>
    %71 = arith.divf %29, %70 : vector<16x1xf32>
    %cst_28 = arith.constant 1.000000e+00 : f32
    %72 = vector.broadcast %cst_28 : f32 to vector<16x1xf32>
    %73 = arith.subf %72, %71 : vector<16x1xf32>
    %cst_29 = arith.constant 1.000000e+01 : f32
    %74 = vector.broadcast %cst_29 : f32 to vector<16x1xf32>
    %75 = arith.mulf %74, %73 : vector<16x1xf32>
    %cst_30 = arith.constant 0.000000e+00 : f32
    %76 = vector.broadcast %cst_30 : f32 to vector<16x1xf32>
    %77 = arith.cmpf ogt, %75, %76 : vector<16x1xf32>
    %cst_31 = arith.constant 1.000000e+00 : f32
    %78 = vector.broadcast %cst_31 : f32 to vector<16x1xf32>
    %79 = arith.select %77, %75, %78 : vector<16x1xi1>, vector<16x1xf32>
    %cst_32 = arith.constant 0.000000e+00 : f32
    %80 = vector.broadcast %cst_32 : f32 to vector<16x1xf32>
    %81 = arith.cmpf ogt, %75, %80 : vector<16x1xf32>
    %82 = tpu.reciprocal %79 {approx = true} : vector<16x1xf32> -> vector<16x1xf32>
    %cst_33 = arith.constant 0.000000e+00 : f32
    %83 = vector.broadcast %cst_33 : f32 to vector<16x1xf32>
    %84 = arith.subf %83, %82 : vector<16x1xf32>
    %85 = math.exp %84 : vector<16x1xf32>
    %cst_34 = arith.constant 0.000000e+00 : f32
    %86 = vector.broadcast %cst_34 : f32 to vector<16x1xf32>
    %87 = arith.select %81, %85, %86 : vector<16x1xi1>, vector<16x1xf32>
    %88 = arith.truncf %69 : vector<16x8xf32> to vector<16x8xbf16>
    %c0_35 = arith.constant 0 : index
    %c0_36 = arith.constant 0 : index
    %89 = vector.load %arg8[%c0_35, %c0_36] : memref<8x256xbf16, #tpu.memory_space<vmem>>, vector<8x256xbf16>
    %cst_37 = arith.constant dense<0.000000e+00> : vector<16x256xf32>
    %90 = tpu.matmul %88, %89, %cst_37 {dimension_numbers = #tpu.dot_dimension_numbers<[1], [0], [0], [1], [0, 0, 1, 1], [], []>} : vector<16x8xbf16>, vector<8x256xbf16>, vector<16x256xf32> -> vector<16x256xf32>
    %91 = arith.truncf %3 : vector<16x8xf32> to vector<16x8xbf16>
    %c0_38 = arith.constant 0 : index
    %c0_39 = arith.constant 0 : index
    %92 = vector.load %arg9[%c0_38, %c0_39] : memref<8x256xbf16, #tpu.memory_space<vmem>>, vector<8x256xbf16>
    %cst_40 = arith.constant dense<0.000000e+00> : vector<16x256xf32>
    %93 = tpu.matmul %91, %92, %cst_40 {dimension_numbers = #tpu.dot_dimension_numbers<[1], [0], [0], [1], [0, 0, 1, 1], [], []>} : vector<16x8xbf16>, vector<8x256xbf16>, vector<16x256xf32> -> vector<16x256xf32>
    %94 = arith.addf %90, %93 : vector<16x256xf32>
    %95 = arith.negf %94 : vector<16x256xf32>
    %96 = math.exp %95 : vector<16x256xf32>
    %cst_41 = arith.constant 1.000000e+00 : f32
    %97 = vector.broadcast %cst_41 : f32 to vector<16x256xf32>
    %98 = arith.addf %97, %96 : vector<16x256xf32>
    %99 = arith.divf %97, %98 : vector<16x256xf32>
    %100 = arith.mulf %94, %99 : vector<16x256xf32>
    %101 = arith.truncf %100 : vector<16x256xf32> to vector<16x256xbf16>
    %c0_42 = arith.constant 0 : index
    %c0_43 = arith.constant 0 : index
    %102 = vector.load %arg10[%c0_42, %c0_43] : memref<256x512xbf16, #tpu.memory_space<vmem>>, vector<256x512xbf16>
    %cst_44 = arith.constant dense<0.000000e+00> : vector<16x512xf32>
    %103 = tpu.matmul %101, %102, %cst_44 {dimension_numbers = #tpu.dot_dimension_numbers<[1], [0], [0], [1], [0, 0, 1, 1], [], []>} : vector<16x256xbf16>, vector<256x512xbf16>, vector<16x512xf32> -> vector<16x512xf32>
    %cst_45 = arith.constant dense<0.000000e+00> : vector<32x16xf32>
    %104 = tpu.matmul %10, %0, %cst_45 {dimension_numbers = #tpu.dot_dimension_numbers<[1], [0], [0], [1], [0, 0, 1, 1], [], []>} : vector<32x8xf32>, vector<8x16xf32>, vector<32x16xf32> -> vector<32x16xf32>
    %105 = vector.extract_strided_slice %104 {offsets = [0, 0], sizes = [16, 16], strides = [1, 1]} : vector<32x16xf32> to vector<16x16xf32>
    %106 = vector.extract_strided_slice %104 {offsets = [16, 0], sizes = [16, 16], strides = [1, 1]} : vector<32x16xf32> to vector<16x16xf32>
    %c0_46 = arith.constant 0 : index
    %c0_47 = arith.constant 0 : index
    %107 = vector.load %arg11[%c0_46, %c0_47] : memref<16x512xf32, #tpu.memory_space<vmem>>, vector<16x512xf32>
    %cst_48 = arith.constant dense<0.000000e+00> : vector<16x512xf32>
    %108 = tpu.matmul %105, %107, %cst_48 {dimension_numbers = #tpu.dot_dimension_numbers<[1], [0], [0], [1], [0, 0, 1, 1], [], []>} : vector<16x16xf32>, vector<16x512xf32>, vector<16x512xf32> -> vector<16x512xf32>
    %109 = arith.mulf %108, %103 : vector<16x512xf32>
    %c0_49 = arith.constant 0 : index
    %c0_50 = arith.constant 0 : index
    %110 = vector.load %arg13[%c0_49, %c0_50] : memref<512x32xf32, #tpu.memory_space<vmem>>, vector<512x32xf32>
    %cst_51 = arith.constant dense<0.000000e+00> : vector<16x32xf32>
    %111 = tpu.matmul %109, %110, %cst_51 {dimension_numbers = #tpu.dot_dimension_numbers<[1], [0], [0], [1], [0, 0, 1, 1], [], []>} : vector<16x512xf32>, vector<512x32xf32>, vector<16x32xf32> -> vector<16x32xf32>
    %112 = vector.extract_strided_slice %111 {offsets = [0, 0], sizes = [16, 16], strides = [1, 1]} : vector<16x32xf32> to vector<16x16xf32>
    %113 = vector.extract_strided_slice %111 {offsets = [0, 16], sizes = [16, 16], strides = [1, 1]} : vector<16x32xf32> to vector<16x16xf32>
    %c0_52 = arith.constant 0 : index
    %c0_53 = arith.constant 0 : index
    %114 = vector.load %arg6[%c0_52, %c0_53] : memref<16x16xf32, #tpu.memory_space<vmem>>, vector<16x16xf32>
    %cst_54 = arith.constant dense<0.000000e+00> : vector<16x16xf32>
    %115 = tpu.matmul %106, %114, %cst_54 {dimension_numbers = #tpu.dot_dimension_numbers<[1], [0], [0], [1], [0, 0, 1, 1], [], []>} : vector<16x16xf32>, vector<16x16xf32>, vector<16x16xf32> -> vector<16x16xf32>
    %116 = arith.mulf %115, %112 : vector<16x16xf32>
    %cst_55 = arith.constant dense<0.000000e+00> : vector<16xf32>
    %117 = vector.multi_reduction <add>, %116, %cst_55 [1] : vector<16x16xf32> to vector<16xf32>
    %118 = vector.shape_cast %117 : vector<16xf32> to vector<16x1xf32>
    %119 = arith.mulf %87, %118 : vector<16x1xf32>
    %120 = math.exp %119 : vector<16x1xf32>
    %cst_56 = arith.constant dense<0.000000e+00> : vector<16x1xf32>
    %121 = tpu.matmul %23, %120, %cst_56 {dimension_numbers = #tpu.dot_dimension_numbers<[1], [0], [0], [1], [0, 0, 1, 1], [], []>} : vector<16x16xf32>, vector<16x1xf32>, vector<16x1xf32> -> vector<16x1xf32>
    %122 = tpu.reciprocal %121 {approx = true} : vector<16x1xf32> -> vector<16x1xf32>
    %123 = arith.mulf %120, %122 : vector<16x1xf32>
    %cst_57 = arith.constant 0.000000e+00 : f32
    %124 = vector.broadcast %cst_57 : f32 to vector<16x1xf32>
    %125 = arith.maximumf %123, %124 : vector<16x1xf32>
    %cst_58 = arith.constant 9.99999982E-15 : f32
    %126 = vector.broadcast %cst_58 : f32 to vector<16x1xf32>
    %127 = arith.addf %125, %126 : vector<16x1xf32>
    %128 = math.sqrt %127 : vector<16x1xf32>
    %c0_59 = arith.constant 0 : index
    %c0_60 = arith.constant 0 : index
    %129 = vector.load %arg7[%c0_59, %c0_60] : memref<16x128xf32, #tpu.memory_space<vmem>>, vector<16x128xf32>
    %cst_61 = arith.constant dense<0.000000e+00> : vector<8x128xf32>
    %130 = tpu.matmul %0, %129, %cst_61 {dimension_numbers = #tpu.dot_dimension_numbers<[1], [0], [0], [1], [0, 0, 1, 1], [], []>} : vector<8x16xf32>, vector<16x128xf32>, vector<8x128xf32> -> vector<8x128xf32>
    %c0_62 = arith.constant 0 : index
    %c0_63 = arith.constant 0 : index
    %131 = vector.load %arg12[%c0_62, %c0_63] : memref<8x128xf32, #tpu.memory_space<vmem>>, vector<8x128xf32>
    %cst_64 = arith.constant dense<0.000000e+00> : vector<8x128xf32>
    %132 = tpu.matmul %2, %131, %cst_64 {dimension_numbers = #tpu.dot_dimension_numbers<[1], [0], [0], [1], [0, 0, 1, 1], [], []>} : vector<8x8xf32>, vector<8x128xf32>, vector<8x128xf32> -> vector<8x128xf32>
    %133 = arith.mulf %132, %130 : vector<8x128xf32>
    %c0_65 = arith.constant 0 : index
    %c0_66 = arith.constant 0 : index
    %134 = vector.load %arg14[%c0_65, %c0_66] : memref<128x16xf32, #tpu.memory_space<vmem>>, vector<128x16xf32>
    %cst_67 = arith.constant dense<0.000000e+00> : vector<8x16xf32>
    %135 = tpu.matmul %133, %134, %cst_67 {dimension_numbers = #tpu.dot_dimension_numbers<[1], [0], [0], [1], [0, 0, 1, 1], [], []>} : vector<8x128xf32>, vector<128x16xf32>, vector<8x16xf32> -> vector<8x16xf32>
    %136 = vector.broadcast %128 : vector<16x1xf32> to vector<16x16xf32>
    %137 = arith.mulf %136, %113 : vector<16x16xf32>
    %cst_68 = arith.constant dense<0.000000e+00> : vector<8x16xf32>
    %138 = tpu.matmul %18, %137, %cst_68 {dimension_numbers = #tpu.dot_dimension_numbers<[1], [0], [0], [1], [0, 0, 1, 1], [], []>} : vector<8x16xf32>, vector<16x16xf32>, vector<8x16xf32> -> vector<8x16xf32>
    %139 = arith.addf %135, %138 : vector<8x16xf32>
    %c0_69 = arith.constant 0 : index
    %c0_70 = arith.constant 0 : index
    %140 = vector.load %arg15[%c0_69, %c0_70] : memref<8x16xf32, #tpu.memory_space<vmem>>, vector<8x16xf32>
    tpu.vector_store %arg15[%c0_69, %c0_70], %139 {strides = array<i32>} : memref<8x16xf32, #tpu.memory_space<vmem>>, vector<8x16xf32>,
    return
  }
}

</mosaic_0001>

<bundles_post_ra>
// kernel: transformer_layer_with_bond.1
= control target key start
LH: loop header
LB: loop body
LE: loop exit
PB: predicated region body
PF: predicated region fallthrough
CT: control target
= control target key end

     0   :  { %20 = vsyncpa [#allocation3], 0  ;;  %s3031_s0 = inlined_call_operand.hbm [shape: f32[8,16], index: 0, kind: input, shape index: {}]   ;;  %s3032_s1 = inlined_call_operand.vmem [shape: f32[8,3], index: 1, kind: input, shape index: {}]   ;;  %s3033_s2 = inlined_call_operand.hbm [shape: f32[8,8], index: 2, kind: input, shape index: {}]   ;;  %s3034_s3 = inlined_call_operand.vmem [shape: f32[16,8], index: 3, kind: input, shape index: {}]   ;;  %s3035_s4 = inlined_call_operand.vmem [shape: s32[32,1], index: 4, kind: input, shape index: {}]   ;;  %s3036_s5 = inlined_call_operand.vmem [shape: s32[1,16], index: 5, kind: input, shape index: {}]   ;;  %s3037_s6 = inlined_call_operand.vmem [shape: f32[16,16], index: 6, kind: input, shape index: {}]   ;;  %s3038_s7 = inlined_call_operand.vmem [shape: f32[16,128], index: 7, kind: input, shape index: {}]   ;;  %s3039_s8 = inlined_call_operand.hbm [shape: bf16[8,256], index: 8, kind: input, shape index: {}]   ;;  %s3040_s9 = inlined_call_operand.hbm [shape: bf16[8,256], index: 9, kind: input, shape index: {}]   ;;  %s3041_s10 = inlined_call_operand.hbm [shape: bf16[256,512], index: 10, kind: input, shape index: {}]   ;;  %s3042_s11 = inlined_call_operand.vmem [shape: f32[16,512], index: 11, kind: input, shape index: {}]   ;;  %s3043_s12 = inlined_call_operand.hbm [shape: f32[8,128], index: 12, kind: input, shape index: {}]   ;;  %s3044_s13 = inlined_call_operand.hbm [shape: f32[512,32], index: 13, kind: input, shape index: {}]   ;;  %s3045_s14 = inlined_call_operand.hbm [shape: f32[128,16], index: 14, kind: input, shape index: {}]   ;;  %s3046_s15 = inlined_call_operand.hbm [shape: f32[8,16], index: 15, kind: output, shape index: {}]  }
   0x1   :  { %21 = vsyncpa [#allocation6], 0 }
   0x2   :  { %22 = vsyncpa [#allocation9], 0 }
   0x3   :  { %23 = vsyncpa [#allocation12], 0 }
   0x4   :  { %24 = vsyncpa [#allocation15], 0 }
   0x5   :  { %25 = vsyncpa [#allocation4], 0  ;;  %s2694_s18 = smov [#allocation5]   ;;  %s2695_s20 = smov [#allocation8]  }
   0x6   :  { %s44_s19 = sshll.u32 %s2694_s18, 4  ;;  %s74_s21 = sshll.u32 %s2695_s20, 4  ;;  %s45_s19 = int_to_ptr.vmem [resolvable:$true] %s44_s19  ;;  %s75_s21 = int_to_ptr.vmem [resolvable:$true] %s74_s21 }
   0x7   :  { %s2510_s22 = scalar_lea.vmem %s45_s19, 128  ;;  %p2515_p1 = scmp.lt.s32.totalorder %s45_s19, %s45_s19 }
   0x8   :  { %p2511_p0 = scmp.ne.s32.totalorder %s45_s19, %s2510_s22  ;;  %p2516_p2 = scmp.lt.s32.totalorder %s2510_s22, %s2510_s22 }
   0xa   :  { %p2517_p3 = por %p2516_p2, %p2515_p1 }
   0xc   :  { %p2518_p4 = pnand %p2517_p3, %p2511_p0 }
   0xe   :  { %2521 = shalt.err (!%p2518_p4)
}
   0xf   :  { %47 = dma.hbm_to_vmem [thread:$0]  %s3033_s2, 128, %s45_s19, [#allocation6]  }
  0x10   :  { %s2530_s25 = scalar_lea.vmem %s75_s21, 128  ;;  %p2535_p6 = scmp.lt.s32.totalorder %s75_s21, %s75_s21 }
  0x11   :  { %p2531_p5 = scmp.ne.s32.totalorder %s75_s21, %s2530_s25  ;;  %p2536_p7 = scmp.lt.s32.totalorder %s2530_s25, %s2530_s25 }
  0x13   :  { %p2537_p8 = por %p2536_p7, %p2535_p6 }
  0x15   :  { %p2538_p9 = pnand %p2537_p8, %p2531_p5 }
  0x17   :  { %2541 = shalt.err (!%p2538_p9)
}
  0x18   :  { %77 = dma.hbm_to_vmem [thread:$0]  %s3040_s9, 128, %s75_s21, [#allocation9]  }
  0x19   :  { %s2696_s28 = smov [#allocation11]   ;;  %s2697_s30 = smov [#allocation2]  }
  0x1a   :  { %s98_s29 = sshll.u32 %s2696_s28, 4  ;;  %s32_s16 = sshll.u32 %s2697_s30, 4  ;;  %s99_s29 = int_to_ptr.vmem [resolvable:$true] %s98_s29  ;;  %s33_s16 = int_to_ptr.vmem [resolvable:$true] %s32_s16 }
  0x1b   :  { %s2550_s17 = scalar_lea.vmem %s99_s29, 128  ;;  %p2555_p11 = scmp.lt.s32.totalorder %s99_s29, %s99_s29 }
  0x1c   :  { %p2551_p10 = scmp.ne.s32.totalorder %s99_s29, %s2550_s17  ;;  %p2556_p12 = scmp.lt.s32.totalorder %s2550_s17, %s2550_s17 }
  0x1e   :  { %p2557_p13 = por %p2556_p12, %p2555_p11 }
  0x20   :  { %p2558_p0 = pnand %p2557_p13, %p2551_p10 }
  0x22   :  { %2561 = shalt.err (!%p2558_p0)
}
  0x23   :  { %101 = dma.hbm_to_vmem [thread:$0]  %s3043_s12, 128, %s99_s29, [#allocation12]  }
  0x24   :  { %s2570_s19 = scalar_lea.vmem %s33_s16, 128  ;;  %p2575_p2 = scmp.lt.s32.totalorder %s33_s16, %s33_s16 }
  0x25   :  { %p2571_p1 = scmp.ne.s32.totalorder %s33_s16, %s2570_s19  ;;  %p2576_p3 = scmp.lt.s32.totalorder %s2570_s19, %s2570_s19 }
  0x27   :  { %p2577_p4 = por %p2576_p3, %p2575_p2 }
  0x29   :  { %p2578_p5 = pnand %p2577_p4, %p2571_p1 }
  0x2b   :  { %2581 = shalt.err (!%p2578_p5)
}
  0x2c   :  { %35 = dma.hbm_to_vmem [thread:$0]  %s3031_s0, 128, %s33_s16, [#allocation3]  }
  0x2d   :  { %s2698_s21 = smov [#allocation7]   ;;  %s2699_s23 = smov [#allocation10]  }
  0x2e   :  { %s64_s22 = sshll.u32 %s2698_s21, 4  ;;  %s83_s24 = sshll.u32 %s2699_s23, 4  ;;  %s65_s22 = int_to_ptr.vmem [resolvable:$true] %s64_s22  ;;  %s84_s24 = int_to_ptr.vmem [resolvable:$true] %s83_s24 }
  0x2f   :  { %s2590_s25 = scalar_lea.vmem %s65_s22, 128  ;;  %p2595_p7 = scmp.lt.s32.totalorder %s65_s22, %s65_s22 }
  0x30   :  { %p2591_p6 = scmp.ne.s32.totalorder %s65_s22, %s2590_s25  ;;  %p2596_p8 = scmp.lt.s32.totalorder %s2590_s25, %s2590_s25 }
  0x32   :  { %p2597_p9 = por %p2596_p8, %p2595_p7 }
  0x34   :  { %p2598_p10 = pnand %p2597_p9, %p2591_p6 }
  0x36   :  { %2601 = shalt.err (!%p2598_p10)
}
  0x37   :  { %67 = dma.hbm_to_vmem [thread:$0]  %s3039_s8, 128, %s65_s22, [#allocation6]  }
  0x38   :  { %s2610_s27 = scalar_lea.vmem %s84_s24, 8192  ;;  %p2615_p12 = scmp.lt.s32.totalorder %s84_s24, %s84_s24 }
  0x39   :  { %p2611_p11 = scmp.ne.s32.totalorder %s84_s24, %s2610_s27  ;;  %p2616_p13 = scmp.lt.s32.totalorder %s2610_s27, %s2610_s27 }
  0x3b   :  { %p2617_p0 = por %p2616_p13, %p2615_p12 }
  0x3d   :  { %p2618_p1 = pnand %p2617_p0, %p2611_p11 }
  0x3f   :  { %2621 = shalt.err (!%p2618_p1)
}
  0x40   :  { %s2700_s0 = smov 256   ;;  %s2701_s28 = smov 16  }
  0x41   :  { %89 = dma.hbm_to_vmem [thread:$0]  %s3041_s10, 8192, %s84_s24, [#allocation9], %s2700_s0, %s2700_s0, %s2701_s28  }
  0x42   :  { %s2702_s16 = smov [#allocation13]  }
  0x43   :  { %s107_s17 = sshll.u32 %s2702_s16, 4  ;;  %s108_s17 = int_to_ptr.vmem [resolvable:$true] %s107_s17 }
  0x44   :  { %s2630_s2 = scalar_lea.vmem %s108_s17, 8192  ;;  %p2635_p3 = scmp.lt.s32.totalorder %s108_s17, %s108_s17 }
  0x45   :  { %p2631_p2 = scmp.ne.s32.totalorder %s108_s17, %s2630_s2  ;;  %p2636_p4 = scmp.lt.s32.totalorder %s2630_s2, %s2630_s2 }
  0x47   :  { %p2637_p5 = por %p2636_p4, %p2635_p3 }
  0x49   :  { %p2638_p6 = pnand %p2637_p5, %p2631_p2 }
  0x4b   :  { %2641 = shalt.err (!%p2638_p6)
}
  0x4c   :  { %s2703_s8 = smov 128   ;;  %s2704_s18 = smov 8  }
  0x4d   :  { %113 = dma.hbm_to_vmem [thread:$0]  %s3044_s13, 8192, %s108_s17, [#allocation12], %s2703_s8, %s2703_s8, %s2704_s18  }
  0x4e   :  { %s2705_s20 = smov [#allocation14]  }
  0x4f   :  { %s119_s21 = sshll.u32 %s2705_s20, 4  ;;  %s120_s21 = int_to_ptr.vmem [resolvable:$true] %s119_s21 }
  0x50   :  { %s2650_s10 = scalar_lea.vmem %s120_s21, 2048  ;;  %p2655_p8 = scmp.lt.s32.totalorder %s120_s21, %s120_s21 }
  0x51   :  { %p2651_p7 = scmp.ne.s32.totalorder %s120_s21, %s2650_s10  ;;  %p2656_p9 = scmp.lt.s32.totalorder %s2650_s10, %s2650_s10 }
  0x53   :  { %p2657_p10 = por %p2656_p9, %p2655_p8 }
  0x55   :  { %p2658_p11 = pnand %p2657_p10, %p2651_p7 }
  0x57   :  { %2661 = shalt.err (!%p2658_p11)
}
  0x58   :  { %125 = dma.hbm_to_vmem [thread:$0]  %s3045_s14, 2048, %s120_s21, [#allocation15], %s2703_s8, %s2703_s8, %s2704_s18  }
  0x59   :  { %2682 = dma.done.wait [#allocation3], 128  }
  0x5a   :  { %2683 = vsyncadd [#allocation3], 4294967168 }
  0x5b   :  { %2684 = dma.done.wait [#allocation6], 256  }
  0x5c   :  { %2685 = vsyncadd [#allocation6], 4294967040 }
  0x5d   :  { %2686 = dma.done.wait [#allocation9], 8320  }
  0x5e   :  { %2687 = vsyncadd [#allocation9], 4294958976 }
  0x5f   :  { %2688 = dma.done.wait [#allocation12], 8320  }
  0x60   :  { %2689 = vsyncadd [#allocation12], 4294958976 }
  0x61   :  { %2690 = dma.done.wait [#allocation15], 2048  }
  0x62   :  { %2691 = vsyncadd [#allocation15], 4294965248  ;;  %v2706_v0 = vmov 0   ;;  %v157_v1 = vld [vmem:[%s3035_s4 + $0x8] sm:$0xff]  ;;  %v156_v2 = vld [vmem:[%s3035_s4] sm:$0xff]  ;;  %v161_v6 = vlaneseq  ;;  %vm204_vm4 = vcmask 64512  }
  0x63   :  { %2345 = vset.pattern.permute.xlu1 %v2706_v0  ;;  %2344 = vset.pattern.permute.xlu0 %v2706_v0  ;;  %v159_v3 = vld [vmem:[%s3035_s4 + $0x18] sm:$0xff]  ;;  %v158_v4 = vld [vmem:[%s3035_s4 + $0x10] sm:$0xff]  ;;  %v152_v5 = vld [vmem:[%s3032_s1] sm:$0xff]  ;;  %v2707_v12 = vmov 0.0   ;;  %vm288_vm5 = vcmask 23552   ;;  %vm384_vm6 = vcmask 1043456  }
  0x64   :  { %423 = vmatprep.mubr.bf16.mxu1 %v2706_v0  ;;  %167 = vperm.xlu1 %2345, %v157_v1   ;;  %v2831_v7 = vand.u32 127, %v161_v6  ;;  %v375_v25 = vld [vmem:[#allocation8] sm:$0xff]  ;;  %v154_v26 = vld [vmem:[%s3034_s3] sm:$0xff]  ;;  %v155_v27 = vld [vmem:[%s3034_s3 + $0x8] sm:$0xff]  ;;  %vm1096_vm15 = vcmask 130048   ;;  %s2710_s4 = smov [#allocation16]  }
  0x65   :  { %164 = vperm.xlu0 %2344, %v156_v2   ;;  %2246 = vmatprep.subr.mxu0 %v152_v5  ;;  %v2039_v28 = vcombine.high %v375_v25, %v375_v25  ;;  %v2038_v29 = vcombine.low %v375_v25, %v375_v25  ;;  %v373_v30 = vld [vmem:[#allocation7] sm:$0xff]  ;;  %v374_v34 = vpack.c.bf16 %v155_v27, %v154_v26  ;;  %v2353_v37 = vld [vmem:[#allocation10 + $0xe8] ss:$16 sps:$4 sm:$0xff]   ;;  %v2355_v38 = vld [vmem:[#allocation10 + $0xec] ss:$16 sps:$4 sm:$0xff]   ;;  %s2015_s30 = sshll.u32 %s2710_s4, 4  ;;  %s2016_s30 = int_to_ptr.vmem [resolvable:$true] %s2015_s30 }
  0x66   :  { %2247 = vmatpush3.msra.mxu0 %v152_v5  ;;  %v2043_v31 = vcombine.high %v373_v30, %v373_v30  ;;  %v2042_v32 = vcombine.low %v373_v30, %v373_v30  ;;  %v2352_v36 = vld [vmem:[#allocation10 + $0xe4] ss:$16 sps:$4 sm:$0xff]   ;;  %v2359_v39 = vld [vmem:[#allocation10 + $0xc8] ss:$16 sps:$4 sm:$0xff]   ;;  %v2361_v40 = vld [vmem:[#allocation10 + $0xcc] ss:$16 sps:$4 sm:$0xff]   ;;  %v309_v49 = vcvt.s32.f32 %v2831_v7  ;;  %p2667_p13 = scmp.lt.s32.totalorder %s2016_s30, %s2016_s30 }
  0x67   :  { %2040 = vmatprep.subr.msk.bf16.mxu1 %vm384_vm6, %v2039_v28  ;;  %v386_v33 = vsel %vm384_vm6, %v2038_v29, 0  ;;  %948 = vmatprep.subr.bf16.mxu0 %v2355_v38  ;;  %v2365_v41 = vld [vmem:[#allocation10 + $0xa8] ss:$16 sps:$4 sm:$0xff]   ;;  %v2367_v42 = vld [vmem:[#allocation10 + $0xac] ss:$16 sps:$4 sm:$0xff]   ;;  %s2662_s16 = scalar_lea.vmem %s2016_s30, 128 }
  0x68   :  { %173 = vperm.xlu1 %2345, %v159_v3   ;;  %406 = vmatpush1.bf16.msra.mxu1 %v386_v33  ;;  %v443_v35 = vsel %vm384_vm6, %v2042_v32, 0  ;;  %v2373_v43 = vld [vmem:[#allocation10 + $0x8c] ss:$16 sps:$4 sm:$0xff]   ;;  %v2371_v44 = vld [vmem:[#allocation10 + $0x88] ss:$16 sps:$4 sm:$0xff]   ;;  %v310_v50 = vadd.f32 1.0, %v309_v49  ;;  %p2663_p12 = scmp.ne.s32.totalorder %s2016_s30, %s2662_s16  ;;  %p2668_p0 = scmp.lt.s32.totalorder %s2662_s16, %s2662_s16 }
  0x69   :  { %170 = vperm.xlu0 %2344, %v158_v4   ;;  %2044 = vmatprep.subr.msk.bf16.mxu1 %vm384_vm6, %v2043_v31  ;;  %v2379_v45 = vld [vmem:[#allocation10 + $0x6c] ss:$16 sps:$4 sm:$0xff]   ;;  %v2377_v46 = vld [vmem:[#allocation10 + $0x68] ss:$16 sps:$4 sm:$0xff]   ;;  %v2368_v49 = vld [vmem:[#allocation10 + $0x80] ss:$16 sps:$4 sm:$0xff]  }
  0x6a   :  { %v311_v52 = vmul.f32 0.6666667, %v310_v50  ;;  %v2376_v50 = vld [vmem:[#allocation10 + $0x64] ss:$16 sps:$4 sm:$0xff]   ;;  %p2669_p1 = por %p2668_p0, %p2667_p13 }
  0x6b   :  { %2041 = vmatmul.mubr.msk.bf16.vlgmr.msra.gmra.mxu1 %vm204_vm4, %v374_v34 }
  0x6c   :  { %463 = vmatpush1.bf16.msra.mxu1 %v443_v35  ;;  %480 = vmatprep.mubr.bf16.mxu1 %v2706_v0  ;;  %p2670_p2 = pnand %p2669_p1, %p2663_p12 }
  0x6d   :  { %905 = vmatprep.subr.bf16.mxu1 %v2352_v36 }
  0xdf   :  { %v168_v8 = vpop.permute.xlu1 %167 }
  0xe0   :  { %v165_v9 = vpop.permute.xlu0 %164  ;;  %vm176_vm0 = vcmp.eq.s32.totalorder %v2831_v7, %v168_v8 }
  0xe1   :  { %vm175_vm1 = vcmp.eq.s32.totalorder %v2831_v7, %v165_v9  ;;  %v2844_v13 = vsel %vm176_vm0, 1.0, %v2707_v12 }
  0xe2   :  { %v2847_v14 = vsel %vm175_vm1, 1.0, %v2707_v12 }
  0xe3   :  { %v2835_v10 = vpop.permute.xlu1 %173 }
  0xe4   :  { %v2837_v11 = vpop.permute.xlu0 %170  ;;  %vm178_vm2 = vcmp.eq.s32.totalorder %v2831_v7, %v2835_v10 }
  0xe5   :  { %vm177_vm3 = vcmp.eq.s32.totalorder %v2831_v7, %v2837_v11  ;;  %v2850_v15 = vsel %vm178_vm2, 1.0, %v2707_v12  ;;  %v2406_v7 = vld [vmem:[#allocation10 + $0x1c4] ss:$16 sps:$4 sm:$0xff]  }
  0xe6   :  { %v2853_v16 = vsel %vm177_vm3, 1.0, %v2707_v12  ;;  %v203_v17 = vsub.f32 %v2844_v13, %v2850_v15 }
  0xe7   :  { %v202_v18 = vsub.f32 %v2847_v14, %v2853_v16 }
  0xe9   :  { %2248 = vmatprep.mubr.msk.f32.mxu0 %vm204_vm4, %v202_v18 }
  0xea   :  { %2249 = vmatmul.mubr.msk.f32.vlgmr.msra.gmra.mxu0 %vm204_vm4, %v203_v17  ;;  %v2407_v17 = vld [vmem:[#allocation10 + $0x1c8] ss:$16 sps:$4 sm:$0xff]  }
  0xeb   :  { %949 = vmatpush1.bf16.msra.mxu0 %v2353_v37 }
  0xec   :  { %950 = vmatprep.subr.bf16.mxu0 %v2361_v40 }
  0xef   :  { %951 = vmatpush1.bf16.msra.mxu0 %v2359_v39 }
  0xf0   :  { %952 = vmatprep.subr.bf16.mxu0 %v2367_v42  ;;  %v2350_v42 = vld [vmem:[#allocation10 + $0xe0] ss:$16 sps:$4 sm:$0xff]  }
  0xf3   :  { %953 = vmatpush1.bf16.msra.mxu0 %v2365_v41 }
  0xf4   :  { %954 = vmatprep.subr.bf16.mxu0 %v2373_v43 }
  0xf7   :  { %955 = vmatpush1.bf16.msra.mxu0 %v2371_v44  ;;  %v2358_v44 = vld [vmem:[#allocation10 + $0xc4] ss:$16 sps:$4 sm:$0xff]  }
  0xf8   :  { %956 = vmatprep.subr.bf16.mxu0 %v2379_v45  ;;  %v2356_v45 = vld [vmem:[#allocation10 + $0xc0] ss:$16 sps:$4 sm:$0xff]  }
  0xfb   :  { %957 = vmatpush1.bf16.msra.mxu0 %v2377_v46  ;;  %v2364_v46 = vld [vmem:[#allocation10 + $0xa4] ss:$16 sps:$4 sm:$0xff]  }
 0x1aa   :  { %v2250_v19 = vpop.f32.mrf.mxu0 }
 0x1ab   :  { %v287_v20 = vmul.f32 %v2250_v19, %v2250_v19 }
 0x1ac   :  { %v277_v21 = vpop.f32.mrf.mxu0 }
 0x1ad   :  { %v286_v22 = vmul.f32 %v277_v21, %v277_v21  ;;  %v292_v23 = vsel %vm288_vm5, %v287_v20, 0.0 }
 0x1ae   :  { %293 = vadd.xlane.f32.xlu1 %v292_v23 }
 0x1af   :  { %v289_v24 = vsel %vm288_vm5, %v286_v22, 0.0  ;;  %vm2708_vm5 = vmmov 0  }
 0x1b0   :  { %290 = vadd.xlane.f32.xlu0 %v289_v24 }
 0x237   :  { %v294_v47 = vpop.xlane.xlu1 %293 }
 0x238   :  { %2446 = vrsqrt.f32 %v294_v47  ;;  %vm304_vm7 = vcmp.eq.f32.partialorder %v294_v47, inf  ;;  %v307_v55 = vand.u32 2147483648, %v294_v47  ;;  %vm306_vm8 = vcmp.eq.f32.partialorder %v294_v47, 0.0 }
 0x239   :  { %v291_v48 = vpop.xlane.xlu0 %290 }
 0x23a   :  { %2448 = vrsqrt.f32 %v291_v48  ;;  %vm297_vm9 = vcmp.eq.f32.partialorder %v291_v48, inf  ;;  %v300_v59 = vand.u32 2147483648, %v291_v48  ;;  %vm299_vm10 = vcmp.eq.f32.partialorder %v291_v48, 0.0 }
 0x245   :  { %v2447_v51 = vpop.eup %2446 }
 0x246   :  { %v303_v53 = vmul.f32 %v2447_v51, %v294_v47  ;;  %v2374_v51 = vld [vmem:[#allocation10 + $0x60] ss:$16 sps:$4 sm:$0xff]  }
 0x247   :  { %v2449_v54 = vpop.eup %2448 }
 0x248   :  { %v305_v56 = vsel %vm304_vm7, %v294_v47, %v303_v53  ;;  %v296_v57 = vmul.f32 %v2449_v54, %v291_v48  ;;  %v2362_v47 = vld [vmem:[#allocation10 + $0xa0] ss:$16 sps:$4 sm:$0xff]   ;;  %v2385_v53 = vld [vmem:[#allocation10 + $0x4c] ss:$16 sps:$4 sm:$0xff]  }
 0x249   :  { %v2869_v58 = vsel %vm306_vm8, %v307_v55, %v305_v56  ;;  %v2380_v54 = vld [vmem:[#allocation10 + $0x40] ss:$16 sps:$4 sm:$0xff]   ;;  %v2383_v55 = vld [vmem:[#allocation10 + $0x48] ss:$16 sps:$4 sm:$0xff]   ;;  %958 = vmatprep.subr.bf16.mxu0 %v2385_v53  ;;  %v2388_v56 = vld [vmem:[#allocation10 + $0x24] ss:$16 sps:$4 sm:$0xff]  }
 0x24a   :  { %v313_v60 = vsub.f32 %v2869_v58, %v311_v52  ;;  %v298_v61 = vsel %vm297_vm9, %v291_v48, %v296_v57  ;;  %v2370_v48 = vld [vmem:[#allocation10 + $0x84] ss:$16 sps:$4 sm:$0xff]   ;;  %959 = vmatpush1.bf16.msra.mxu0 %v2383_v55  ;;  %v2391_v57 = vld [vmem:[#allocation10 + $0x2c] ss:$16 sps:$4 sm:$0xff]  }
 0x24b   :  { %v2872_v62 = vsel %vm299_vm10, %v300_v59, %v298_v61  ;;  %v2386_v59 = vld [vmem:[#allocation10 + $0x20] ss:$16 sps:$4 sm:$0xff]   ;;  %960 = vmatprep.subr.bf16.mxu0 %v2391_v57  ;;  %v2394_v61 = vld [vmem:[#allocation10 + $0x4] ss:$16 sps:$4 sm:$0xff]  }
 0x24c   :  { %v316_v63 = vmul.f32 1.5, %v313_v60  ;;  %v312_v0 = vsub.f32 %v2872_v62, %v311_v52  ;;  %v2382_v52 = vld [vmem:[#allocation10 + $0x44] ss:$16 sps:$4 sm:$0xff]   ;;  %v2389_v60 = vld [vmem:[#allocation10 + $0x28] ss:$16 sps:$4 sm:$0xff]  }
 0x24e   :  { %v318_v1 = vadd.f32 1.0, %v316_v63  ;;  %v334_v2 = vsub.f32 1.0, %v316_v63  ;;  %v315_v3 = vmul.f32 1.5, %v312_v0  ;;  %961 = vmatpush1.bf16.msra.mxu0 %v2389_v60  ;;  %v2397_v63 = vld [vmem:[#allocation10 + $0xc] ss:$16 sps:$4 sm:$0xff]  }
 0x24f   :  { %v2392_v0 = vld [vmem:[#allocation10] ss:$16 sps:$4 sm:$0xff]   ;;  %962 = vmatprep.subr.bf16.mxu0 %v2397_v63 }
 0x250   :  { %v317_v4 = vadd.f32 1.0, %v315_v3  ;;  %v333_v5 = vsub.f32 1.0, %v315_v3  ;;  %vm320_vm11 = vcmp.gt.f32.partialorder %v318_v1, 0.0  ;;  %vm2875_vm12 = vcmp.gt.f32.partialorder %v334_v2, 0.0  ;;  %v2403_v3 = vld [vmem:[#allocation10 + $0x1ec] ss:$16 sps:$4 sm:$0xff]  }
 0x251   :  { %v322_v8 = vsel %vm320_vm11, %v318_v1, 1.0  ;;  %v338_v9 = vsel %vm2875_vm12, %v334_v2, 1.0  ;;  %v2395_v1 = vld [vmem:[#allocation10 + $0x8] ss:$16 sps:$4 sm:$0xff]   ;;  %v2400_v2 = vld [vmem:[#allocation10 + $0x1e4] ss:$16 sps:$4 sm:$0xff]  }
 0x252   :  { %vm319_vm13 = vcmp.gt.f32.partialorder %v317_v4, 0.0  ;;  %2450 = vrcp.f32 %v322_v8  ;;  %vm2882_vm14 = vcmp.gt.f32.partialorder %v333_v5, 0.0  ;;  %963 = vmatpush1.bf16.msra.mxu0 %v2395_v1  ;;  %v2409_v8 = vld [vmem:[#allocation10 + $0x1cc] ss:$16 sps:$4 sm:$0xff]  }
 0x253   :  { %v321_v18 = vsel %vm319_vm13, %v317_v4, 1.0  ;;  %v337_v19 = vsel %vm2882_vm14, %v333_v5, 1.0  ;;  %2452 = vrcp.f32 %v338_v9  ;;  %v2398_v4 = vld [vmem:[#allocation10 + $0x1e0] ss:$16 sps:$4 sm:$0xff]   ;;  %v2401_v5 = vld [vmem:[#allocation10 + $0x1e8] ss:$16 sps:$4 sm:$0xff]   ;;  %964 = vmatprep.subr.bf16.mxu0 %v2403_v3 }
 0x254   :  { %2454 = vrcp.f32 %v321_v18  ;;  %v2404_v9 = vld [vmem:[#allocation10 + $0x1c0] ss:$16 sps:$4 sm:$0xff]   ;;  %v2412_v18 = vld [vmem:[#allocation10 + $0x1a4] ss:$16 sps:$4 sm:$0xff]  }
 0x255   :  { %2456 = vrcp.f32 %v337_v19  ;;  %v2415_v19 = vld [vmem:[#allocation10 + $0x1ac] ss:$16 sps:$4 sm:$0xff]  }
 0x256   :  { %965 = vmatpush2.bf16.msra.mxu0 %v2401_v5 }
 0x257   :  { %966 = vmatprep.subr.bf16.mxu0 %v2409_v8 }
 0x25a   :  { %967 = vmatpush2.bf16.msra.mxu0 %v2407_v17 }
 0x25b   :  { %968 = vmatprep.subr.bf16.mxu0 %v2415_v19 }
 0x25f   :  { %v2451_v20 = vpop.eup %2450 }
 0x260   :  { %v2453_v21 = vpop.eup %2452  ;;  %v326_v22 = vsub.f32 0.0, %v2451_v20  ;;  %v2410_v20 = vld [vmem:[#allocation10 + $0x1a0] ss:$16 sps:$4 sm:$0xff]  }
 0x261   :  { %v2455_v23 = vpop.eup %2454  ;;  %v342_v24 = vsub.f32 0.0, %v2453_v21  ;;  %v2413_v21 = vld [vmem:[#allocation10 + $0x1a8] ss:$16 sps:$4 sm:$0xff]  }
 0x262   :  { %v2457_v25 = vpop.eup %2456  ;;  %v325_v26 = vsub.f32 0.0, %v2455_v23  ;;  %v329_v27 = vmul.f32 1.442695, %v326_v22  ;;  %969 = vmatpush2.bf16.msra.mxu0 %v2413_v21  ;;  %v2418_v22 = vld [vmem:[#allocation10 + $0x184] ss:$16 sps:$4 sm:$0xff]  }
 0x263   :  { %v341_v28 = vsub.f32 0.0, %v2457_v25  ;;  %v345_v29 = vmul.f32 1.442695, %v342_v24  ;;  %v2421_v23 = vld [vmem:[#allocation10 + $0x18c] ss:$16 sps:$4 sm:$0xff]  }
 0x264   :  { %v327_v30 = vmul.f32 1.442695, %v325_v26  ;;  %2458 = vpow2.f32 %v329_v27  ;;  %v2416_v24 = vld [vmem:[#allocation10 + $0x180] ss:$16 sps:$4 sm:$0xff]   ;;  %v2419_v25 = vld [vmem:[#allocation10 + $0x188] ss:$16 sps:$4 sm:$0xff]   ;;  %970 = vmatprep.subr.bf16.mxu0 %v2421_v23 }
 0x265   :  { %v343_v31 = vmul.f32 1.442695, %v341_v28  ;;  %2460 = vpow2.f32 %v345_v29  ;;  %v2424_v26 = vld [vmem:[#allocation10 + $0x164] ss:$16 sps:$4 sm:$0xff]   ;;  %v2427_v27 = vld [vmem:[#allocation10 + $0x16c] ss:$16 sps:$4 sm:$0xff]  }
 0x266   :  { %2462 = vpow2.f32 %v327_v30  ;;  %971 = vmatpush2.bf16.msra.mxu0 %v2419_v25  ;;  %v2422_v28 = vld [vmem:[#allocation10 + $0x160] ss:$16 sps:$4 sm:$0xff]   ;;  %v2425_v29 = vld [vmem:[#allocation10 + $0x168] ss:$16 sps:$4 sm:$0xff]   ;;  %v2430_v30 = vld [vmem:[#allocation10 + $0x144] ss:$16 sps:$4 sm:$0xff]  }
 0x267   :  { %2464 = vpow2.f32 %v343_v31  ;;  %972 = vmatprep.subr.bf16.mxu0 %v2427_v27  ;;  %v2433_v31 = vld [vmem:[#allocation10 + $0x14c] ss:$16 sps:$4 sm:$0xff]   ;;  %v1280_v25 = vld [vmem:[#allocation13 + $0x78] sm:$0xff] }
 0x268   :  { %v1093_v23 = vld [vmem:[%s3042_s11 + $0x28] sm:$0xff]  ;;  %v1279_v27 = vld [vmem:[#allocation13 + $0x70] sm:$0xff] }
 0x26a   :  { %973 = vmatpush2.bf16.msra.mxu0 %v2425_v29  ;;  %v1278_v29 = vld [vmem:[#allocation13 + $0x68] sm:$0xff] }
 0x26b   :  { %974 = vmatprep.subr.bf16.mxu0 %v2433_v31  ;;  %v1277_v31 = vld [vmem:[#allocation13 + $0x60] sm:$0xff] }
 0x271   :  { %v2459_v32 = vpop.eup %2458 }
 0x272   :  { %v2461_v33 = vpop.eup %2460  ;;  %v332_v35 = vsel %vm320_vm11, %v2459_v32, 0.0  ;;  %v2428_v32 = vld [vmem:[#allocation10 + $0x140] ss:$16 sps:$4 sm:$0xff]  }
 0x273   :  { %v2463_v34 = vpop.eup %2462  ;;  %v348_v36 = vsel %vm2875_vm12, %v2461_v33, 0.0  ;;  %v2431_v33 = vld [vmem:[#allocation10 + $0x148] ss:$16 sps:$4 sm:$0xff]  }
 0x274   :  { %v2465_v37 = vpop.eup %2464  ;;  %v331_v38 = vsel %vm319_vm13, %v2463_v34, 0.0  ;;  %v350_v41 = vmul.f32 %v348_v36, %v332_v35  ;;  %975 = vmatpush2.bf16.msra.mxu0 %v2431_v33  ;;  %v2436_v34 = vld [vmem:[#allocation10 + $0x124] ss:$16 sps:$4 sm:$0xff]   ;;  %v2439_v35 = vld [vmem:[#allocation10 + $0x12c] ss:$16 sps:$4 sm:$0xff]  }
 0x275   :  { %v347_v39 = vsel %vm2882_vm14, %v2465_v37, 0.0  ;;  %v2434_v36 = vld [vmem:[#allocation10 + $0x120] ss:$16 sps:$4 sm:$0xff]   ;;  %v2437_v37 = vld [vmem:[#allocation10 + $0x128] ss:$16 sps:$4 sm:$0xff]   ;;  %976 = vmatprep.subr.bf16.mxu0 %v2439_v35 }
 0x276   :  { %v349_v40 = vmul.f32 %v347_v39, %v331_v38  ;;  %v2442_v38 = vld [vmem:[#allocation10 + $0x104] ss:$16 sps:$4 sm:$0xff]   ;;  %v2445_v39 = vld [vmem:[#allocation10 + $0x10c] ss:$16 sps:$4 sm:$0xff]  }
 0x277   :  { %v1276_v33 = vld [vmem:[#allocation13 + $0x58] sm:$0xff]  ;;  %v1275_v35 = vld [vmem:[#allocation13 + $0x50] sm:$0xff] }
 0x278   :  { %v372_v43 = vpack.c.bf16 %v350_v41, %v349_v40  ;;  %977 = vmatpush2.bf16.msra.mxu0 %v2437_v37  ;;  %v2440_v40 = vld [vmem:[#allocation10 + $0x100] ss:$16 sps:$4 sm:$0xff]   ;;  %v2443_v41 = vld [vmem:[#allocation10 + $0x108] ss:$16 sps:$4 sm:$0xff]  }
 0x279   :  { %978 = vmatprep.subr.bf16.mxu0 %v2445_v39  ;;  %v1274_v37 = vld [vmem:[#allocation13 + $0x48] sm:$0xff]  ;;  %v1273_v39 = vld [vmem:[#allocation13 + $0x40] sm:$0xff] }
 0x27a   :  { %2045 = vmatmul.mubr.msk.bf16.vlgmr.msra.gmra.mxu1 %vm204_vm4, %v372_v43  ;;  %v425_v43 = vpop.f32.mrf.mxu1 }
 0x27b   :  { %906 = vmatpush1.bf16.msra.mxu1 %v2350_v42  ;;  %v2896_v42 = vld [vmem:[#allocation2] sm:$0xff] }
 0x27c   :  { %907 = vmatprep.subr.bf16.mxu1 %v2358_v44  ;;  %979 = vmatpush2.bf16.msra.mxu0 %v2443_v41  ;;  %v427_v44 = vpop.f32.mrf.mxu1  ;;  %v1272_v41 = vld [vmem:[#allocation13 + $0x38] sm:$0xff] }
 0x27f   :  { %908 = vmatpush1.bf16.msra.mxu1 %v2356_v45  ;;  %v429_v45 = vpop.f32.mrf.mxu1 }
 0x280   :  { %909 = vmatprep.subr.bf16.mxu1 %v2364_v46 }
 0x281   :  { %v431_v46 = vpop.f32.mrf.mxu1 }
 0x283   :  { %910 = vmatpush1.bf16.msra.mxu1 %v2362_v47 }
 0x284   :  { %911 = vmatprep.subr.bf16.mxu1 %v2370_v48 }
 0x287   :  { %912 = vmatpush1.bf16.msra.mxu1 %v2368_v49 }
 0x288   :  { %913 = vmatprep.subr.bf16.mxu1 %v2376_v50 }
 0x28b   :  { %914 = vmatpush1.bf16.msra.mxu1 %v2374_v51 }
 0x28c   :  { %915 = vmatprep.subr.bf16.mxu1 %v2382_v52 }
 0x28f   :  { %916 = vmatpush1.bf16.msra.mxu1 %v2380_v54 }
 0x290   :  { %917 = vmatprep.subr.bf16.mxu1 %v2388_v56 }
 0x293   :  { %918 = vmatpush1.bf16.msra.mxu1 %v2386_v59 }
 0x294   :  { %919 = vmatprep.subr.bf16.mxu1 %v2394_v61 }
 0x297   :  { %920 = vmatpush1.bf16.msra.mxu1 %v2392_v0 }
 0x298   :  { %921 = vmatprep.subr.bf16.mxu1 %v2400_v2 }
 0x29b   :  { %922 = vmatpush2.bf16.msra.mxu1 %v2398_v4 }
 0x29c   :  { %923 = vmatprep.subr.bf16.mxu1 %v2406_v7 }
 0x29f   :  { %924 = vmatpush2.bf16.msra.mxu1 %v2404_v9 }
 0x2a0   :  { %925 = vmatprep.subr.bf16.mxu1 %v2412_v18 }
 0x2a3   :  { %926 = vmatpush2.bf16.msra.mxu1 %v2410_v20 }
 0x2a4   :  { %927 = vmatprep.subr.bf16.mxu1 %v2418_v22 }
 0x2a7   :  { %928 = vmatpush2.bf16.msra.mxu1 %v2416_v24  ;;  %v1296_v24 = vld [vmem:[#allocation13 + $0xf8] sm:$0xff] }
 0x2a8   :  { %929 = vmatprep.subr.bf16.mxu1 %v2424_v26  ;;  %v1295_v26 = vld [vmem:[#allocation13 + $0xf0] sm:$0xff]  ;;  %2137 = vmatprep.subr.mxu0 %v1296_v24  ;;  %v1282_v24 = vld [vmem:[#allocation13 + $0x88] sm:$0xff] }
 0x2ab   :  { %930 = vmatpush2.bf16.msra.mxu1 %v2422_v28  ;;  %v1294_v28 = vld [vmem:[#allocation13 + $0xe8] sm:$0xff] }
 0x2ac   :  { %931 = vmatprep.subr.bf16.mxu1 %v2430_v30  ;;  %v1293_v30 = vld [vmem:[#allocation13 + $0xe0] sm:$0xff] }
 0x2af   :  { %932 = vmatpush2.bf16.msra.mxu1 %v2428_v32  ;;  %v1292_v32 = vld [vmem:[#allocation13 + $0xd8] sm:$0xff] }
 0x2b0   :  { %933 = vmatprep.subr.bf16.mxu1 %v2436_v34  ;;  %v1291_v34 = vld [vmem:[#allocation13 + $0xd0] sm:$0xff] }
 0x2b3   :  { %934 = vmatpush2.bf16.msra.mxu1 %v2434_v36  ;;  %v1290_v36 = vld [vmem:[#allocation13 + $0xc8] sm:$0xff] }
 0x2b4   :  { %935 = vmatprep.subr.bf16.mxu1 %v2442_v38  ;;  %v1289_v38 = vld [vmem:[#allocation13 + $0xc0] sm:$0xff] }
 0x2b7   :  { %936 = vmatpush2.bf16.msra.mxu1 %v2440_v40  ;;  %v1288_v40 = vld [vmem:[#allocation13 + $0xb8] sm:$0xff] }
 0x2b8   :  { %2251 = vmatprep.subr.mxu1 %v2896_v42 }
 0x33a   :  { %v482_v47 = vpop.f32.mrf.mxu1 }
 0x33b   :  { %v483_v48 = vadd.f32 %v482_v47, %v425_v43  ;;  %v1287_v43 = vld [vmem:[#allocation13 + $0xb0] sm:$0xff]  ;;  %v1285_v47 = vld [vmem:[#allocation13 + $0xa0] sm:$0xff] }
 0x33c   :  { %v484_v49 = vpop.f32.mrf.mxu1 }
 0x33d   :  { %v2046_v50 = vmul.f32 -1.442695, %v483_v48  ;;  %v485_v51 = vadd.f32 %v484_v49, %v427_v44  ;;  %v1271_v44 = vld [vmem:[#allocation13 + $0x30] sm:$0xff]  ;;  %v1284_v49 = vld [vmem:[#allocation13 + $0x98] sm:$0xff] }
 0x33e   :  { %v486_v52 = vpop.f32.mrf.mxu1 }
 0x33f   :  { %v2047_v53 = vmul.f32 -1.442695, %v485_v51  ;;  %v487_v54 = vadd.f32 %v486_v52, %v429_v45  ;;  %2466 = vpow2.f32 %v2046_v50  ;;  %v1286_v45 = vld [vmem:[#allocation13 + $0xa8] sm:$0xff]  ;;  %v1268_v50 = vld [vmem:[#allocation13 + $0x18] sm:$0xff] }
 0x340   :  { %v488_v55 = vpop.f32.mrf.mxu1 }
 0x341   :  { %2468 = vpow2.f32 %v2047_v53  ;;  %v2048_v56 = vmul.f32 -1.442695, %v487_v54  ;;  %v489_v57 = vadd.f32 %v488_v55, %v431_v46  ;;  %v1270_v46 = vld [vmem:[#allocation13 + $0x28] sm:$0xff] }
 0x343   :  { %2470 = vpow2.f32 %v2048_v56  ;;  %v2049_v59 = vmul.f32 -1.442695, %v489_v57  ;;  %v1094_v56 = vld [vmem:[%s3042_s11 + $0x30] sm:$0xff] }
 0x345   :  { %2472 = vpow2.f32 %v2049_v59  ;;  %v1091_v59 = vld [vmem:[%s3042_s11 + $0x18] sm:$0xff] }
 0x34c   :  { %v2467_v60 = vpop.eup %2466 }
 0x34d   :  { %v503_v1 = vadd.f32 1.0, %v2467_v60  ;;  %v1090_v60 = vld [vmem:[%s3042_s11 + $0x10] sm:$0xff] }
 0x34e   :  { %v2469_v61 = vpop.eup %2468 }
 0x34f   :  { %v504_v63 = vadd.f32 1.0, %v2469_v61  ;;  %v1328_v61 = vld [vmem:[#allocation13 + $0x1f8] sm:$0xff] }
 0x350   :  { %v2471_v0 = vpop.eup %2470 }
 0x351   :  { %v505_v2 = vadd.f32 1.0, %v2471_v0  ;;  %2474 = vrcp.f32 %v504_v63  ;;  %v1312_v63 = vld [vmem:[#allocation13 + $0x178] sm:$0xff]  ;;  %v1327_v0 = vld [vmem:[#allocation13 + $0x1f0] sm:$0xff] }
 0x352   :  { %v2473_v3 = vpop.eup %2472 }
 0x353   :  { %2476 = vrcp.f32 %v505_v2  ;;  %v506_v4 = vadd.f32 1.0, %v2473_v3  ;;  %v1326_v2 = vld [vmem:[#allocation13 + $0x1e8] sm:$0xff] }
 0x354   :  { %2478 = vrcp.f32 %v503_v1  ;;  %v1311_v1 = vld [vmem:[#allocation13 + $0x170] sm:$0xff]  ;;  %v1310_v3 = vld [vmem:[#allocation13 + $0x168] sm:$0xff] }
 0x355   :  { %2480 = vrcp.f32 %v506_v4  ;;  %v1325_v4 = vld [vmem:[#allocation13 + $0x1e0] sm:$0xff] }
 0x35e   :  { %v2475_v5 = vpop.eup %2474 }
 0x35f   :  { %v516_v18 = vmul.f32 %v2475_v5, %v485_v51  ;;  %v1309_v5 = vld [vmem:[#allocation13 + $0x160] sm:$0xff] }
 0x360   :  { %v2477_v7 = vpop.eup %2476 }
 0x361   :  { %v2479_v8 = vpop.eup %2478  ;;  %v517_v17 = vmul.f32 %v2477_v7, %v487_v54  ;;  %v1324_v7 = vld [vmem:[#allocation13 + $0x1d8] sm:$0xff] }
 0x362   :  { %v2481_v9 = vpop.eup %2480  ;;  %v515_v20 = vmul.f32 %v2479_v8, %v483_v48  ;;  %v1269_v48 = vld [vmem:[#allocation13 + $0x20] sm:$0xff]  ;;  %v1308_v8 = vld [vmem:[#allocation13 + $0x158] sm:$0xff] }
 0x363   :  { %v518_v19 = vmul.f32 %v2481_v9, %v489_v57  ;;  %v1323_v9 = vld [vmem:[#allocation13 + $0x1d0] sm:$0xff] }
 0x364   :  { %v519_v22 = vpack.c.bf16 %v517_v17, %v515_v20  ;;  %v1307_v17 = vld [vmem:[#allocation13 + $0x150] sm:$0xff]  ;;  %v1321_v20 = vld [vmem:[#allocation13 + $0x1c0] sm:$0xff] }
 0x365   :  { %v520_v21 = vpack.c.bf16 %v518_v19, %v516_v18  ;;  %v1322_v18 = vld [vmem:[#allocation13 + $0x1c8] sm:$0xff] }
 0x366   :  { %v1306_v19 = vld [vmem:[#allocation13 + $0x148] sm:$0xff] }
 0x367   :  { %937 = vmatprep.mubr.bf16.mxu1 %v520_v21  ;;  %980 = vmatprep.mubr.bf16.mxu0 %v520_v21  ;;  %v1305_v21 = vld [vmem:[#allocation13 + $0x140] sm:$0xff] }
 0x368   :  { %938 = vmatmul.mubr.bf16.vlgmr.msra.gmra.mxu1 %v519_v22  ;;  %981 = vmatmul.mubr.bf16.vlgmr.msra.gmra.mxu0 %v519_v22  ;;  %v1320_v22 = vld [vmem:[#allocation13 + $0x1b8] sm:$0xff] }
 0x369   :  { %2252 = vmatpush3.msra.mxu1 %v2896_v42  ;;  %2253 = vmatprep.mubr.msk.f32.mxu1 %vm204_vm4, %v2847_v14  ;;  %v1092_v14 = vld [vmem:[%s3042_s11 + $0x20] sm:$0xff] }
 0x36a   :  { %1131 = vmatprep.subr.mxu1 %v1093_v23  ;;  %2138 = vmatpush3.msra.mxu0 %v1280_v25  ;;  %v1304_v23 = vld [vmem:[#allocation13 + $0x138] sm:$0xff]  ;;  %v1318_v25 = vld [vmem:[#allocation13 + $0x1a8] sm:$0xff] }
 0x36b   :  { %2139 = vmatprep.subr.mxu0 %v1295_v26  ;;  %v1266_v26 = vld [vmem:[#allocation13 + $0x8] sm:$0xff] }
 0x36c   :  { %2140 = vmatpush3.msra.mxu0 %v1279_v27  ;;  %v1302_v27 = vld [vmem:[#allocation13 + $0x128] sm:$0xff] }
 0x36d   :  { %2141 = vmatprep.subr.mxu0 %v1294_v28  ;;  %v1281_v28 = vld [vmem:[#allocation13 + $0x80] sm:$0xff] }
 0x36e   :  { %2142 = vmatpush3.msra.mxu0 %v1278_v29  ;;  %v1317_v29 = vld [vmem:[#allocation13 + $0x1a0] sm:$0xff] }
 0x36f   :  { %2143 = vmatprep.subr.mxu0 %v1293_v30  ;;  %v1265_v30 = vld [vmem:[#allocation13] sm:$0xff] }
 0x370   :  { %2254 = vmatmul.mubr.msk.f32.vlgmr.msra.gmra.mxu1 %vm204_vm4, %v2844_v13  ;;  %v1089_v13 = vld [vmem:[%s3042_s11 + $0x8] sm:$0xff]  ;;  %2144 = vmatpush3.msra.mxu0 %v1277_v31 }
 0x371   :  { %2256 = vmatprep.mubr.msk.f32.mxu1 %vm204_vm4, %v2853_v16  ;;  %1132 = vmatpush1.msra.mxu1 %v1092_v14  ;;  %v1095_v16 = vld [vmem:[%s3042_s11 + $0x38] sm:$0xff]  ;;  %v1301_v31 = vld [vmem:[#allocation13 + $0x120] sm:$0xff] }
 0x372   :  { %1133 = vmatprep.subr.mxu1 %v1089_v13  ;;  %2145 = vmatprep.subr.mxu0 %v1292_v32  ;;  %v1283_v14 = vld [vmem:[#allocation13 + $0x90] sm:$0xff]  ;;  %v1316_v32 = vld [vmem:[#allocation13 + $0x198] sm:$0xff] }
 0x373   :  { %2146 = vmatpush3.msra.mxu0 %v1276_v33  ;;  %v1319_v13 = vld [vmem:[#allocation13 + $0x1b0] sm:$0xff]  ;;  %v1300_v33 = vld [vmem:[#allocation13 + $0x118] sm:$0xff] }
 0x374   :  { %2257 = vmatmul.mubr.msk.f32.gmra.mxu1 %vm204_vm4, %v2850_v15  ;;  %v1088_v15 = vld [vmem:[%s3042_s11] sm:$0xff]  ;;  %2147 = vmatprep.subr.mxu0 %v1291_v34  ;;  %v1315_v34 = vld [vmem:[#allocation13 + $0x190] sm:$0xff] }
 0x375   :  { %1167 = vmatprep.mubr.f32.mxu1 %v2707_v12  ;;  %1134 = vmatpush1.msra.mxu1 %v1088_v15  ;;  %v1267_v15 = vld [vmem:[#allocation13 + $0x10] sm:$0xff] }
 0x376   :  { %1208 = vmatprep.subr.mxu1 %v1095_v16  ;;  %2148 = vmatpush3.msra.mxu0 %v1275_v35  ;;  %v1303_v16 = vld [vmem:[#allocation13 + $0x130] sm:$0xff] }
 0x377   :  { %2149 = vmatprep.subr.mxu0 %v1290_v36  ;;  %v1299_v35 = vld [vmem:[#allocation13 + $0x110] sm:$0xff]  ;;  %v1314_v36 = vld [vmem:[#allocation13 + $0x188] sm:$0xff] }
 0x378   :  { %2150 = vmatpush3.msra.mxu0 %v1274_v37  ;;  %v1480_v37 = vld [vmem:[%s3037_s6 + $0x8] sm:$0xff] }
 0x379   :  { %2151 = vmatprep.subr.mxu0 %v1289_v38  ;;  %v1298_v38 = vld [vmem:[#allocation13 + $0x108] sm:$0xff] }
 0x37a   :  { %2152 = vmatpush3.msra.mxu0 %v1273_v39  ;;  %v1313_v39 = vld [vmem:[#allocation13 + $0x180] sm:$0xff] }
 0x37b   :  { %2153 = vmatprep.subr.mxu0 %v1288_v40  ;;  %v1297_v40 = vld [vmem:[#allocation13 + $0x100] sm:$0xff] }
 0x37c   :  { %2154 = vmatpush3.msra.mxu0 %v1272_v41 }
 0x37d   :  { %2155 = vmatprep.subr.mxu0 %v1287_v43 }
 0x37e   :  { %2156 = vmatpush3.msra.mxu0 %v1271_v44 }
 0x37f   :  { %2157 = vmatprep.subr.mxu0 %v1286_v45 }
 0x380   :  { %2158 = vmatpush3.msra.mxu0 %v1270_v46 }
 0x381   :  { %2159 = vmatprep.subr.mxu0 %v1285_v47 }
 0x382   :  { %2160 = vmatpush3.msra.mxu0 %v1269_v48 }
 0x383   :  { %2161 = vmatprep.subr.mxu0 %v1284_v49 }
 0x384   :  { %2162 = vmatpush3.msra.mxu0 %v1268_v50  ;;  %v1479_v50 = vld [vmem:[%s3037_s6] sm:$0xff] }
 0x385   :  { %2163 = vmatprep.subr.mxu0 %v1283_v14 }
 0x386   :  { %2164 = vmatpush3.msra.mxu0 %v1267_v15 }
 0x387   :  { %2165 = vmatprep.subr.mxu0 %v1282_v24 }
 0x388   :  { %2166 = vmatpush3.msra.mxu0 %v1266_v26 }
 0x389   :  { %2167 = vmatprep.subr.mxu0 %v1281_v28  ;;  %v353_v28 = vmul.f32 0.16666667, %v2869_v58 }
 0x38a   :  { %2168 = vmatpush3.msra.mxu0 %v1265_v30  ;;  %v352_v30 = vmul.f32 0.16666667, %v2872_v62 }
 0x38b   :  { %2259 = vmatprep.subr.mxu0 %v1480_v37 }
 0x428   :  { %v2924_v51 = vpop.f32.mrf.mxu1  ;;  %v982_v45 = vpop.f32.mrf.mxu0 }
 0x42a   :  { %v2926_v52 = vpop.f32.mrf.mxu1 }
 0x42c   :  { %v2928_v53 = vpop.f32.mrf.mxu1 }
 0x42e   :  { %v2930_v54 = vpop.f32.mrf.mxu1 }
 0x430   :  { %v2255_v55 = vpop.f32.mrf.mxu1 }
 0x432   :  { %v1069_v57 = vpop.f32.mrf.mxu1 }
 0x433   :  { %2118 = vmatmul.mubr.msk.f32.vlgmr.msra.gmra.mxu1 %vm1096_vm15, %v1069_v57 }
 0x434   :  { %1209 = vmatpush1.msra.mxu1 %v1094_v56  ;;  %1173 = vmatprep.mubr.f32.mxu1 %v2707_v12  ;;  %v2258_v41 = vpop.f32.mrf.mxu1 }
 0x435   :  { %1210 = vmatprep.subr.mxu1 %v1091_v59  ;;  %v2961_v59 = vld [vmem:[%s3036_s5] ss:$0 sm:$0xff] }
 0x436   :  { %1211 = vmatpush1.msra.mxu1 %v1090_v60  ;;  %v1079_v43 = vpop.f32.mrf.mxu1  ;;  %vm196_vm0 = vcmp.eq.s32.totalorder %v2837_v11, %v2961_v59  ;;  %vm197_vm3 = vcmp.eq.s32.totalorder %v2835_v10, %v2961_v59  ;;  %v153_v10 = vld [vmem:[#allocation5] sm:$0xff] }
 0x437   :  { %2119 = vmatmul.mubr.msk.f32.gmra.mxu1 %vm1096_vm15, %v2255_v55  ;;  %2175 = vmatprep.subr.mxu1 %v1328_v61 }
 0x438   :  { %1244 = vmatprep.mubr.f32.mxu1 %v2707_v12 }
 0x43b   :  { %2120 = vmatmul.mubr.msk.f32.vlgmr.msra.gmra.mxu1 %vm1096_vm15, %v1069_v57 }
 0x43c   :  { %1250 = vmatprep.mubr.f32.mxu1 %v2707_v12  ;;  %2176 = vmatpush3.msra.mxu1 %v1312_v63 }
 0x43d   :  { %2177 = vmatprep.subr.mxu1 %v1327_v0 }
 0x43e   :  { %2178 = vmatpush3.msra.mxu1 %v1311_v1  ;;  %v2034_v1 = vsel %vm196_vm0, 1.0, %v2707_v12 }
 0x43f   :  { %2121 = vmatmul.mubr.msk.f32.gmra.mxu1 %vm1096_vm15, %v2255_v55  ;;  %2179 = vmatprep.subr.mxu1 %v1326_v2  ;;  %v984_v55 = vpop.f32.mrf.mxu0 }
 0x440   :  { %2180 = vmatpush3.msra.mxu1 %v1310_v3 }
 0x441   :  { %2181 = vmatprep.subr.mxu1 %v1325_v4  ;;  %v986_v60 = vpop.f32.mrf.mxu0 }
 0x442   :  { %2182 = vmatpush3.msra.mxu1 %v1309_v5 }
 0x443   :  { %2183 = vmatprep.subr.mxu1 %v1324_v7  ;;  %v988_v2 = vpop.f32.mrf.mxu0 }
 0x444   :  { %2184 = vmatpush3.msra.mxu1 %v1308_v8 }
 0x445   :  { %2185 = vmatprep.subr.mxu1 %v1323_v9 }
 0x446   :  { %2186 = vmatpush3.msra.mxu1 %v1307_v17 }
 0x447   :  { %2187 = vmatprep.subr.mxu1 %v1322_v18 }
 0x448   :  { %2188 = vmatpush3.msra.mxu1 %v1306_v19 }
 0x449   :  { %2189 = vmatprep.subr.mxu1 %v1321_v20 }
 0x44a   :  { %2190 = vmatpush3.msra.mxu1 %v1305_v21 }
 0x44b   :  { %2191 = vmatprep.subr.mxu1 %v1320_v22 }
 0x44c   :  { %2192 = vmatpush3.msra.mxu1 %v1304_v23 }
 0x44d   :  { %2193 = vmatprep.subr.mxu1 %v1319_v13 }
 0x44e   :  { %2194 = vmatpush3.msra.mxu1 %v1303_v16 }
 0x44f   :  { %2195 = vmatprep.subr.mxu1 %v1318_v25 }
 0x450   :  { %2196 = vmatpush3.msra.mxu1 %v1302_v27 }
 0x451   :  { %2197 = vmatprep.subr.mxu1 %v1317_v29  ;;  %v355_v29 = vsub.f32 1.0, %v353_v28  ;;  %v1836_v28 = vld [vmem:[#allocation14 + $0x38] sm:$0xff] }
 0x452   :  { %2198 = vmatpush3.msra.mxu1 %v1301_v31 }
 0x453   :  { %2199 = vmatprep.subr.mxu1 %v1316_v32  ;;  %v357_v31 = vmul.f32 10.0, %v355_v29  ;;  %v354_v32 = vsub.f32 1.0, %v352_v30  ;;  %v1835_v29 = vld [vmem:[#allocation14 + $0x30] sm:$0xff]  ;;  %v1834_v30 = vld [vmem:[#allocation14 + $0x28] sm:$0xff] }
 0x454   :  { %2200 = vmatpush3.msra.mxu1 %v1300_v33 }
 0x455   :  { %2201 = vmatprep.subr.mxu1 %v1315_v34  ;;  %vm359_vm1 = vcmp.gt.f32.partialorder %v357_v31, 0.0  ;;  %v356_v33 = vmul.f32 10.0, %v354_v32  ;;  %v1832_v32 = vld [vmem:[#allocation14 + $0x18] sm:$0xff] }
 0x456   :  { %2202 = vmatpush3.msra.mxu1 %v1299_v35  ;;  %v361_v34 = vsel %vm359_vm1, %v357_v31, 1.0  ;;  %v1833_v31 = vld [vmem:[#allocation14 + $0x20] sm:$0xff] }
 0x457   :  { %2203 = vmatprep.subr.mxu1 %v1314_v36  ;;  %vm358_vm2 = vcmp.gt.f32.partialorder %v356_v33, 0.0  ;;  %2482 = vrcp.f32 %v361_v34 }
 0x458   :  { %2204 = vmatpush3.msra.mxu1 %v1298_v38  ;;  %v360_v35 = vsel %vm358_vm2, %v356_v33, 1.0  ;;  %v1831_v33 = vld [vmem:[#allocation14 + $0x10] sm:$0xff] }
 0x459   :  { %2205 = vmatprep.subr.mxu1 %v1313_v39  ;;  %2484 = vrcp.f32 %v360_v35 }
 0x45a   :  { %2206 = vmatpush3.msra.mxu1 %v1297_v40 }
 0x45b   :  { %2273 = vmatprep.subr.mxu1 %v2707_v12 }
 0x464   :  { %v2483_v36 = vpop.eup %2482 }
 0x466   :  { %v2485_v38 = vpop.eup %2484 }
 0x467   :  { %v364_v40 = vsub.f32 0.0, %v2485_v38  ;;  %v1829_v38 = vld [vmem:[#allocation14] sm:$0xff] }
 0x469   :  { %v366_v58 = vmul.f32 1.442695, %v364_v40 }
 0x4f3   :  { %v1169_v44 = vpop.f32.mrf.mxu1 }
 0x4f4   :  { %v1257_v48 = vmul.f32 %v1169_v44, %v2924_v51 }
 0x4f5   :  { %v1171_v46 = vpop.f32.mrf.mxu1 }
 0x4f6   :  { %v1258_v47 = vmul.f32 %v1171_v46, %v2926_v52 }
 0x4f7   :  { %v1175_v49 = vpop.f32.mrf.mxu1 }
 0x4f8   :  { %1393 = vmatprep.mubr.f32.mxu0 %v1258_v47  ;;  %v1261_v52 = vmul.f32 %v1175_v49, %v2928_v53 }
 0x4f9   :  { %v1177_v56 = vpop.f32.mrf.mxu1  ;;  %1394 = vmatmul.mubr.f32.vlgmr.msra.gmra.mxu0 %v1257_v48 }
 0x4fa   :  { %v1262_v57 = vmul.f32 %v1177_v56, %v2930_v54  ;;  %2260 = vmatpush3.msra.mxu0 %v1480_v37  ;;  %v365_v37 = vsub.f32 0.0, %v2483_v36  ;;  %v1830_v36 = vld [vmem:[#allocation14 + $0x8] sm:$0xff] }
 0x4fb   :  { %v1246_v51 = vpop.f32.mrf.mxu1  ;;  %2261 = vmatprep.subr.mxu0 %v1479_v50 }
 0x4fc   :  { %1398 = vmatprep.mubr.f32.mxu0 %v1262_v57  ;;  %2262 = vmatpush3.msra.mxu0 %v1479_v50  ;;  %v1259_v54 = vmul.f32 %v1246_v51, %v982_v45  ;;  %v368_v39 = vmul.f32 1.442695, %v365_v37  ;;  %v2035_v57 = vsel %vm197_vm3, 1.0, %v2707_v12  ;;  %v1679_v51 = vld [vmem:[%s3038_s7] sm:$0xff] }
 0x4fd   :  { %v1248_v61 = vpop.f32.mrf.mxu1  ;;  %1399 = vmatmul.mubr.f32.gmra.mxu0 %v1261_v52  ;;  %v1680_v52 = vld [vmem:[%s3038_s7 + $0x8] sm:$0xff]  ;;  %s2709_s7 = smov 112  }
 0x4fe   :  { %v1260_v63 = vmul.f32 %v1248_v61, %v984_v55  ;;  %2263 = vmatprep.mubr.msk.f32.mxu0 %vm1096_vm15, %v1079_v43  ;;  %2486 = vpow2.f32 %v368_v39 }
 0x4ff   :  { %v1252_v0 = vpop.f32.mrf.mxu1  ;;  %2488 = vpow2.f32 %v366_v58 }
 0x500   :  { %1468 = vmatprep.mubr.f32.mxu1 %v1260_v63  ;;  %v1263_v4 = vmul.f32 %v1252_v0, %v986_v60  ;;  %v1754_v60 = vld [vmem:[#allocation11] sm:$0xff] }
 0x501   :  { %v1254_v53 = vpop.f32.mrf.mxu1  ;;  %1469 = vmatmul.mubr.f32.vlgmr.msra.gmra.mxu1 %v1259_v54  ;;  %2264 = vmatmul.mubr.msk.f32.vlgmr.msra.gmra.mxu0 %vm1096_vm15, %v2258_v41 }
 0x502   :  { %v1264_v3 = vmul.f32 %v1254_v53, %v988_v2  ;;  %2270 = vmatprep.mubr.msk.f32.mxu0 %vm1096_vm15, %v2034_v1  ;;  %2274 = vmatpush3.msra.mxu1 %v1680_v52 }
 0x503   :  { %2275 = vmatprep.subr.mxu1 %v2707_v12 }
 0x504   :  { %1473 = vmatprep.mubr.f32.mxu1 %v1264_v3  ;;  %2276 = vmatpush3.msra.mxu1 %v1679_v51 }
 0x505   :  { %1474 = vmatmul.mubr.f32.gmra.mxu1 %v1263_v4  ;;  %2285 = vmatprep.subr.mxu1 %v2707_v12 }
 0x506   :  { %2277 = vmatprep.mubr.msk.f32.mxu1 %vm2708_vm5, %v2707_v12 }
 0x509   :  { %2278 = vmatmul.mubr.msk.f32.vlgmr.msra.gmra.mxu1 %vm1096_vm15, %v2896_v42 }
 0x50a   :  { %2289 = vmatprep.mubr.msk.f32.mxu1 %vm2708_vm5, %v2707_v12 }
 0x50b   :  { %v2487_v62 = vpop.eup %2486 }
 0x50c   :  { %v371_v41 = vsel %vm359_vm1, %v2487_v62, 0.0  ;;  %v2489_v44 = vpop.eup %2488 }
 0x50d   :  { %v370_v47 = vsel %vm358_vm2, %v2489_v44, 0.0  ;;  %v188_v44 = vshrl.u32 %v161_v6, 7 }
 0x50f   :  { %vm193_vm9 = vcmp.eq.s32.totalorder %v188_v44, %v2961_v59 }
 0x5b9   :  { %v2169_v11 = vpop.f32.mrf.mxu0 }
 0x5bb   :  { %v2170_v5 = vpop.f32.mrf.mxu0 }
 0x5bc   :  { %v2171_v21 = vadd.f32 %v2170_v5, %v2169_v11 }
 0x5bd   :  { %v2172_v7 = vpop.f32.mrf.mxu0 }
 0x5bf   :  { %v2173_v17 = vpop.f32.mrf.mxu0 }
 0x5c0   :  { %v2174_v22 = vadd.f32 %v2173_v17, %v2172_v7 }
 0x5c1   :  { %v2207_v8 = vpop.f32.mrf.mxu1  ;;  %v2265_v14 = vpop.f32.mrf.mxu0 }
 0x5c3   :  { %v2208_v9 = vpop.f32.mrf.mxu1  ;;  %v1553_v24 = vpop.f32.mrf.mxu0 }
 0x5c4   :  { %v2209_v19 = vadd.f32 %v2208_v9, %v2207_v8 }
 0x5c5   :  { %v2210_v18 = vpop.f32.mrf.mxu1 }
 0x5c6   :  { %v2970_v13 = vadd.f32 %v2209_v19, %v2171_v21 }
 0x5c7   :  { %v2211_v20 = vpop.f32.mrf.mxu1 }
 0x5c8   :  { %v2212_v23 = vadd.f32 %v2211_v20, %v2210_v18  ;;  %v1562_v25 = vmul.f32 %v1553_v24, %v2970_v13  ;;  %v1840_v24 = vld [vmem:[#allocation14 + $0x58] sm:$0xff] }
 0x5c9   :  { %v1750_v34 = vpop.f32.mrf.mxu1 }
 0x5ca   :  { %v2972_v15 = vadd.f32 %v2212_v23, %v2174_v22  ;;  %v1564_v27 = vsel %vm1096_vm15, %v1562_v25, 0.0  ;;  %v1844_v22 = vld [vmem:[#allocation14 + $0x78] sm:$0xff]  ;;  %v1843_v23 = vld [vmem:[#allocation14 + $0x70] sm:$0xff] }
 0x5cb   :  { %v1839_v25 = vld [vmem:[#allocation14 + $0x50] sm:$0xff]  ;;  %v2279_v39 = vpop.f32.mrf.mxu1 }
 0x5cc   :  { %v1563_v16 = vmul.f32 %v2265_v14, %v2972_v15  ;;  %v1842_v14 = vld [vmem:[#allocation14 + $0x68] sm:$0xff] }
 0x5ce   :  { %v1567_v26 = vsel %vm1096_vm15, %v1563_v16, 0.0  ;;  %v1841_v16 = vld [vmem:[#allocation14 + $0x60] sm:$0xff] }
 0x5cf   :  { %1568 = vadd.xlane.f32.xlu0 %v1567_v26  ;;  %v1838_v26 = vld [vmem:[#allocation14 + $0x48] sm:$0xff] }
 0x5d3   :  { %1565 = vadd.xlane.f32.xlu0 %v1564_v27  ;;  %v1837_v27 = vld [vmem:[#allocation14 + $0x40] sm:$0xff] }
 0x658   :  { %v1569_v43 = vpop.xlane.xlu0 %1568 }
 0x659   :  { %v1571_v45 = vmul.f32 %v1569_v43, %v371_v41 }
 0x65b   :  { %v1574_v46 = vmul.f32 1.442695, %v1571_v45 }
 0x65c   :  { %v1566_v48 = vpop.xlane.xlu0 %1565 }
 0x65d   :  { %2490 = vpow2.f32 %v1574_v46  ;;  %v1570_v49 = vmul.f32 %v1566_v48, %v370_v47  ;;  %v2033_v46 = vsel %vm193_vm9, 1.0, %v2707_v12 }
 0x65f   :  { %v1572_v50 = vmul.f32 1.442695, %v1570_v49 }
 0x661   :  { %2492 = vpow2.f32 %v1572_v50 }
 0x66a   :  { %v2491_v55 = vpop.eup %2490 }
 0x66b   :  { %2266 = vmatprep.subr.mxu0 %v2491_v55 }
 0x66c   :  { %2267 = vmatpush3.msra.mxu0 %v2491_v55 }
 0x66e   :  { %v2493_v56 = vpop.eup %2492 }
 0x66f   :  { %2268 = vmatprep.subr.mxu0 %v2493_v56 }
 0x670   :  { %2269 = vmatpush3.msra.mxu0 %v2493_v56 }
 0x671   :  { %2271 = vmatmul.mubr.msk.f32.vlgmr.msra.gmra.mxu0 %vm1096_vm15, %v2035_v57  ;;  %2280 = vmatprep.subr.mxu0 %v2707_v12 }
 0x672   :  { %2281 = vmatpush3.msra.mxu0 %v1754_v60  ;;  %2282 = vmatprep.mubr.msk.f32.mxu0 %vm2708_vm5, %v2707_v12 }
 0x673   :  { %2292 = vmatprep.subr.mxu0 %v2707_v12 }
 0x675   :  { %2283 = vmatmul.mubr.msk.f32.vlgmr.msra.gmra.mxu0 %vm204_vm4, %v153_v10 }
 0x676   :  { %2324 = vmatprep.mubr.msk.f32.mxu0 %vm2708_vm5, %v2707_v12  ;;  %2293 = vmatpush3.msra.mxu0 %v1844_v22 }
 0x677   :  { %2294 = vmatprep.subr.mxu0 %v2707_v12 }
 0x678   :  { %2295 = vmatpush3.msra.mxu0 %v1843_v23 }
 0x679   :  { %2296 = vmatprep.subr.mxu0 %v2707_v12 }
 0x67a   :  { %2297 = vmatpush3.msra.mxu0 %v1842_v14 }
 0x67b   :  { %2298 = vmatprep.subr.mxu0 %v2707_v12 }
 0x67c   :  { %2299 = vmatpush3.msra.mxu0 %v1841_v16 }
 0x67d   :  { %2300 = vmatprep.subr.mxu0 %v2707_v12 }
 0x67e   :  { %2301 = vmatpush3.msra.mxu0 %v1840_v24 }
 0x67f   :  { %2302 = vmatprep.subr.mxu0 %v2707_v12 }
 0x680   :  { %2303 = vmatpush3.msra.mxu0 %v1839_v25 }
 0x681   :  { %2304 = vmatprep.subr.mxu0 %v2707_v12 }
 0x682   :  { %2305 = vmatpush3.msra.mxu0 %v1838_v26 }
 0x683   :  { %2306 = vmatprep.subr.mxu0 %v2707_v12 }
 0x684   :  { %2307 = vmatpush3.msra.mxu0 %v1837_v27 }
 0x685   :  { %2308 = vmatprep.subr.mxu0 %v2707_v12 }
 0x686   :  { %2309 = vmatpush3.msra.mxu0 %v1836_v28 }
 0x687   :  { %2310 = vmatprep.subr.mxu0 %v2707_v12 }
 0x688   :  { %2311 = vmatpush3.msra.mxu0 %v1835_v29 }
 0x689   :  { %2312 = vmatprep.subr.mxu0 %v2707_v12 }
 0x68a   :  { %2313 = vmatpush3.msra.mxu0 %v1834_v30 }
 0x68b   :  { %2314 = vmatprep.subr.mxu0 %v2707_v12 }
 0x68c   :  { %2315 = vmatpush3.msra.mxu0 %v1833_v31 }
 0x68d   :  { %2316 = vmatprep.subr.mxu0 %v2707_v12 }
 0x68e   :  { %2317 = vmatpush3.msra.mxu0 %v1832_v32 }
 0x68f   :  { %2318 = vmatprep.subr.mxu0 %v2707_v12 }
 0x690   :  { %2319 = vmatpush3.msra.mxu0 %v1831_v33 }
 0x691   :  { %2320 = vmatprep.subr.mxu0 %v2707_v12 }
 0x692   :  { %2321 = vmatpush3.msra.mxu0 %v1830_v36 }
 0x693   :  { %2322 = vmatprep.subr.mxu0 %v2707_v12 }
 0x694   :  { %2323 = vmatpush3.msra.mxu0 %v1829_v38 }
 0x731   :  { %v2272_v61 = vpop.f32.mrf.mxu0 }
 0x732   :  { %2494 = vrcp.f32 %v2272_v61 }
 0x733   :  { %v1648_v63 = vpop.f32.mrf.mxu0 }
 0x734   :  { %2496 = vrcp.f32 %v1648_v63 }
 0x735   :  { %v1824_v35 = vpop.f32.mrf.mxu0 }
 0x736   :  { %v1828_v37 = vmul.f32 %v1824_v35, %v1750_v34 }
 0x737   :  { %v2284_v40 = vpop.f32.mrf.mxu0 }
 0x738   :  { %2325 = vmatmul.mubr.f32.vlgmr.msra.gmra.mxu0 %v1828_v37 }
 0x73f   :  { %v2495_v54 = vpop.eup %2494 }
 0x740   :  { %v1660_v0 = vmul.f32 %v2495_v54, %v2491_v55 }
 0x741   :  { %v2497_v1 = vpop.eup %2496 }
 0x742   :  { %v1662_v2 = vmax.f32 %v1660_v0, 0.0  ;;  %v1659_v53 = vmul.f32 %v2497_v1, %v2493_v56 }
 0x744   :  { %v1664_v42 = vadd.f32 1e-14, %v1662_v2  ;;  %v1661_v3 = vmax.f32 %v1659_v53, 0.0 }
 0x746   :  { %v1663_v4 = vadd.f32 1e-14, %v1661_v3  ;;  %2498 = vrsqrt.f32 %v1664_v42  ;;  %vm1674_vm4 = vcmp.eq.f32.partialorder %v1664_v42, inf  ;;  %v1677_v8 = vand.u32 2147483648, %v1664_v42 }
 0x747   :  { %vm1676_vm6 = vcmp.eq.f32.partialorder %v1664_v42, 0.0 }
 0x748   :  { %2500 = vrsqrt.f32 %v1663_v4  ;;  %vm1667_vm7 = vcmp.eq.f32.partialorder %v1663_v4, inf  ;;  %v1670_v19 = vand.u32 2147483648, %v1663_v4  ;;  %vm1669_vm8 = vcmp.eq.f32.partialorder %v1663_v4, 0.0 }
 0x753   :  { %v2499_v11 = vpop.eup %2498 }
 0x754   :  { %v1673_v5 = vmul.f32 %v2499_v11, %v1664_v42 }
 0x755   :  { %v2501_v7 = vpop.eup %2500 }
 0x756   :  { %v1675_v9 = vsel %vm1674_vm4, %v1664_v42, %v1673_v5  ;;  %v1666_v17 = vmul.f32 %v2501_v7, %v1663_v4 }
 0x757   :  { %v1678_v18 = vsel %vm1676_vm6, %v1677_v8, %v1675_v9 }
 0x758   :  { %1852 = vperm.xlu1 %2345, %v1678_v18   ;;  %v1668_v20 = vsel %vm1667_vm7, %v1663_v4, %v1666_v17 }
 0x759   :  { %v1671_v21 = vsel %vm1669_vm8, %v1670_v19, %v1668_v20 }
 0x75a   :  { %1847 = vperm.xlu0 %2344, %v1671_v21  }
 0x7d3   :  { %v1853_v58 = vpop.permute.xlu1 %1852 }
 0x7d4   :  { %v1856_v62 = vmul.f32 %v1853_v58, %v2972_v15 }
 0x7d5   :  { %v1848_v41 = vpop.permute.xlu0 %1847 }
 0x7d6   :  { %1861 = vrot.lane.b32.xlu1 %v1856_v62, %s2709_s7  ;;  %v1855_v43 = vmul.f32 %v1848_v41, %v2970_v13 }
 0x7da   :  { %1859 = vrot.lane.b32.xlu1 %v1855_v43, %s2709_s7 }
 0x7f8   :  { %v2004_v15 = vpop.f32.mrf.mxu0 }
 0x7fa   :  { %v2326_v48 = vpop.f32.mrf.mxu0 }
 0x848   :  { %v1862_v45 = vpop.permute.xlu1 %1861 }
 0x849   :  { %2286 = vmatpush3.msra.mxu1 %v1862_v45 }
 0x84a   :  { %2287 = vmatprep.subr.mxu1 %v2707_v12 }
 0x84c   :  { %v1860_v47 = vpop.permute.xlu1 %1859 }
 0x84d   :  { %2288 = vmatpush3.msra.mxu1 %v1860_v47 }
 0x84e   :  { %2290 = vmatmul.mubr.msk.f32.vlgmr.msra.gmra.mxu1 %vm1096_vm15, %v2033_v46 }
 0x90e   :  { %v1934_v13 = vpop.f32.mrf.mxu1 }
 0x90f   :  { %v2005_v49 = vadd.f32 %v2004_v15, %v1934_v13 }
 0x910   :  { %v2291_v6 = vpop.f32.mrf.mxu1 }
 0x911   :  { %2008 = vst.msk [vmem:[#allocation16] sm:$0xff] %vm1096_vm15, %v2005_v49 }
 0x912   :  { %2673 = shalt.err (!%p2670_p2)
}
 0x913   :  { %2018 = dma.vmem_to_hbm [thread:$0]  %s2016_s30, 128, %s3046_s15, [#allocation4]  }
 0x914   :  { %2692 = dma.done.wait [#allocation4], 128  }
 0x915   :  { %2693 = vsyncadd [#allocation4], 4294967168 }
 0x916   :  { %2022 = vsyncpa [#allocation3], 1 }
 0x917   :  { %2023 = vsyncpa [#allocation6], 1 }
 0x918   :  { %2024 = vsyncpa [#allocation9], 1 }
 0x919   :  { %2025 = vsyncpa [#allocation12], 1 }
 0x91a   :  { %2026 = vsyncpa [#allocation15], 1 }
 0x91b   :  { %2027 = vsyncpa [#allocation4], 1 }

</bundles_post_ra>
